<compile_context>
chip_gen: v5e
topology: v5e:2x2
jax: 0.10.0
libtpu: 0.0.40
codegen_flags: <defaults>
</compile_context>

<pallas_src>
import jax
import jax.numpy as jnp
from jax import lax
from jax.experimental import pallas as pl
from jax.experimental.pallas import tpu as pltpu

DIM = 64          # embedding dim
FIRST = 128       # first MLP layer width


def _round_up(x, m):
    return ((x + m - 1) // m) * m


def ncf_kernel(u_ref, i_ref,
               w1u_ref, w1i_ref, b1_ref,
               w2_ref, b2_ref,
               w3_ref, b3_ref,
               hmlp_ref, hmf_ref, bh_ref,
               out_ref):
    ue = u_ref[...]                                  # f32 [TB, 64]
    ie = i_ref[...]                                  # f32 [TB, 64]

    # ---- MLP branch (bf16 MXU chain, f32 accumulation) ----
    # cat([u, i]) @ W1  ==  u @ W1[:64] + i @ W1[64:]   (split-K, no concat)
    h = (jnp.dot(ue.astype(jnp.bfloat16), w1u_ref[...],
                 preferred_element_type=jnp.float32)
         + jnp.dot(ie.astype(jnp.bfloat16), w1i_ref[...],
                   preferred_element_type=jnp.float32)
         + b1_ref[...])
    h = jnp.maximum(h, 0.0)                          # Linear -> (Dropout=id) -> ReLU

    h = jnp.dot(h.astype(jnp.bfloat16), w2_ref[...],
                preferred_element_type=jnp.float32) + b2_ref[...]
    h = jnp.maximum(h, 0.0)

    h = jnp.dot(h.astype(jnp.bfloat16), w3_ref[...],
                preferred_element_type=jnp.float32) + b3_ref[...]
    h = jnp.maximum(h, 0.0)                          # [TB, 32] f32
    # (layer 4 has no ReLU -> folded into the head weight hmlp in the wrapper)

    # ---- GMF branch in f32 (matches the f32 reference exactly) ----
    gmf = ue * ie                                    # [TB, 64] f32

    # ---- NeuMF head, transposed so the batch dim lands in lanes ----
    # pred[r, t] = sum_k lhs[r, k] * feat[t, k]   (same dim-numbers as q @ k.T)
    dn = (((1,), (1,)), ((), ()))
    pred = (lax.dot_general(hmlp_ref[...], h, dn,
                            preferred_element_type=jnp.float32)
            + lax.dot_general(hmf_ref[...], gmf, dn,
                              preferred_element_type=jnp.float32))   # [8, TB]
    out_ref[...] = pred[0:1, :] + bh_ref[...]                        # [1, TB]


def _resident_spec(shape):
    # Un-tiled operand: block = full array, constant block index (stays
    # resident in VMEM across grid steps, no per-step re-DMA).
    return pl.BlockSpec(shape, lambda b: (0,) * len(shape))


def ncf_forward(uembd, iembd, params, *, tb=None):
    """uembd, iembd: [B, DIM] float32 (already gathered).  Returns [B] f32."""
    B = uembd.shape[0]
    (w1, b1, w2, b2, w3, b3, w4, b4, wn, bn) = params

    # Split the NeuMF weight for the cat([mlp, mf]) matmul, then fold W4/b4
    # into the head (no ReLU after layer 4):  h3 @ W4 @ Wn_mlp == h3 @ w4n.
    wn_mlp, wn_mf = wn[: FIRST // 4], wn[FIRST // 4:]
    w4n = (w4 @ wn_mlp).astype(jnp.float32)                        # [32, 1]
    bh = (bn + b4 @ wn_mlp).reshape(1, 1).astype(jnp.float32)      # [1, 1]
    # Head weights as (8, K) rows (M padded to the 8-sublane MXU granule;
    # only row 0 of the result is used).
    hmlp = jnp.broadcast_to(w4n.T, (8, FIRST // 4)).astype(jnp.float32)
    hmf = jnp.broadcast_to(wn_mf.T, (8, DIM)).astype(jnp.float32)

    # bf16 weights for the MXU chain; f32 biases for the f32 accumulators.
    w1u = w1[:DIM].astype(jnp.bfloat16)       # [64, 128]
    w1i = w1[DIM:].astype(jnp.bfloat16)       # [64, 128]
    w2b = w2.astype(jnp.bfloat16)
    w3b = w3.astype(jnp.bfloat16)
    b1r = b1.reshape(1, -1).astype(jnp.float32)
    b2r = b2.reshape(1, -1).astype(jnp.float32)
    b3r = b3.reshape(1, -1).astype(jnp.float32)

    # Batch tile: large (up to 4096) to amortize the ~0.35us/step grid
    # overhead; for large batches keep >=2 grid steps so both v7x TensorCores
    # get work.  Per-tile VMEM at tb=4096 (f32 inputs + intermediates) is
    # ~10 MB -> well under the default scoped VMEM limit on v5e/v6e/v7x.
    if tb is None:
        if B <= 1024:
            tb = _round_up(max(B, 1), 512)
        else:
            tb = min(4096, _round_up((B + 1) // 2, 512))
    tb = _round_up(tb, 128)
    b_pad = _round_up(B, tb)

    ue = uembd.astype(jnp.float32)
    ie = iembd.astype(jnp.float32)
    if b_pad != B:
        ue = jnp.pad(ue, ((0, b_pad - B), (0, 0)))
        ie = jnp.pad(ie, ((0, b_pad - B), (0, 0)))

    flops = 2 * b_pad * (2 * DIM * FIRST + FIRST * (FIRST // 2)
                         + (FIRST // 2) * (FIRST // 4)
                         + (FIRST // 4) + 2 * DIM)
    bytes_accessed = b_pad * (2 * DIM * 4 + 4) + 128 * 1024
    cost = pl.CostEstimate(flops=flops, transcendentals=0,
                           bytes_accessed=bytes_accessed)

    out = pl.pallas_call(
        ncf_kernel,
        out_shape=jax.ShapeDtypeStruct((1, b_pad), jnp.float32),
        grid_spec=pltpu.PrefetchScalarGridSpec(
            num_scalar_prefetch=0,
            grid=(b_pad // tb,),
            in_specs=[
                pl.BlockSpec((tb, DIM), lambda b: (b, 0)),   # u tile
                pl.BlockSpec((tb, DIM), lambda b: (b, 0)),   # i tile
                _resident_spec(w1u.shape), _resident_spec(w1i.shape),
                _resident_spec(b1r.shape),
                _resident_spec(w2b.shape), _resident_spec(b2r.shape),
                _resident_spec(w3b.shape), _resident_spec(b3r.shape),
                _resident_spec(hmlp.shape), _resident_spec(hmf.shape),
                _resident_spec(bh.shape),
            ],
            out_specs=pl.BlockSpec((1, tb), lambda b: (0, b)),   # lane-dense
        ),
        compiler_params=pltpu.CompilerParams(
            dimension_semantics=("parallel",)),
        cost_estimate=cost,
    )(ue, ie, w1u, w1i, b1r, w2b, b2r, w3b, b3r, hmlp, hmf, bh)

    return out[0, :B]    # prediction.flatten(); drops padded tail rows


def init_params(key, user_num, item_num, dim=DIM, first_layer=FIRST):
    """Deterministic synthetic parameters (shapes match the nn.Module)."""
    ks = jax.random.split(key, 16)

    def lin(kw, kb, fan_in, fan_out):
        bound = 1.0 / jnp.sqrt(fan_in)
        w = jax.random.uniform(kw, (fan_in, fan_out), jnp.float32, -bound, bound)
        b = jax.random.uniform(kb, (fan_out,), jnp.float32, -bound, bound)
        return w, b

    u_embd = jax.random.normal(ks[0], (user_num, dim), jnp.float32)
    i_embd = jax.random.normal(ks[1], (item_num, dim), jnp.float32)
    # mf_uEmbd / mf_iEmbd exist in the module but are unused in forward().
    _mf_u = jax.random.normal(ks[2], (user_num, dim), jnp.float32)
    _mf_i = jax.random.normal(ks[3], (item_num, dim), jnp.float32)

    w1, b1 = lin(ks[4], ks[5], dim * 2, first_layer)                  # 128 -> 128
    w2, b2 = lin(ks[6], ks[7], first_layer, first_layer // 2)         # 128 -> 64
    w3, b3 = lin(ks[8], ks[9], first_layer // 2, first_layer // 4)    # 64  -> 32
    w4, b4 = lin(ks[10], ks[11], first_layer // 4, first_layer // 4)  # 32  -> 32
    wn, bn = lin(ks[12], ks[13], dim + first_layer // 4, 1)           # 96  -> 1

    mlp_params = (w1, b1, w2, b2, w3, b3, w4, b4, wn, bn)
    return u_embd, i_embd, mlp_params


def reference_forward(uembd, iembd, params):
    """Pure-JAX f32 reference mirroring the PyTorch forward (dropout = identity)."""
    (w1, b1, w2, b2, w3, b3, w4, b4, wn, bn) = params
    embd = jnp.concatenate([uembd, iembd], axis=1)
    h = jnp.maximum(embd @ w1 + b1, 0.0)
    h = jnp.maximum(h @ w2 + b2, 0.0)
    h = jnp.maximum(h @ w3 + b3, 0.0)
    h = h @ w4 + b4
    mf = uembd * iembd
    pred = jnp.concatenate([h, mf], axis=1) @ wn + bn
    return pred.reshape(-1)


if __name__ == "__main__":
    key = jax.random.PRNGKey(0)
    k_param, k_u, k_i = jax.random.split(key, 3)

    USER_NUM, ITEM_NUM, B = 100, 200, 300

    u_embd_table, i_embd_table, mlp_params = init_params(k_param, USER_NUM, ITEM_NUM)

    user_idx = jax.random.randint(k_u, (B,), 0, USER_NUM, dtype=jnp.int32)
    item_idx = jax.random.randint(k_i, (B,), 0, ITEM_NUM, dtype=jnp.int32)

    # Embedding lookups (glue, plain JAX gather).
    # TODO(synk): for production batches, move the gather in-kernel
    # (scalar-prefetch indices + manual DMA row gather from HBM tables) so the
    # gathered [B, 64] activations never make an extra HBM round trip.
    uembd = u_embd_table[user_idx]   # [B, DIM]
    iembd = i_embd_table[item_idx]   # [B, DIM]

    ref = reference_forward(uembd, iembd, mlp_params)

    # Default tile (single grid step at this small size).
    out = jax.block_until_ready(ncf_forward(uembd, iembd, mlp_params))
    assert out.shape == (B,)
    err = float(jnp.max(jnp.abs(out - ref)))
    assert jnp.allclose(out, ref, atol=5e-2, rtol=5e-2), f"max abs err {err}"

    # Small tile -> exercises the multi-step grid + ragged-batch padding path.
    out2 = jax.block_until_ready(ncf_forward(uembd, iembd, mlp_params, tb=128))
    err2 = float(jnp.max(jnp.abs(out2 - ref)))
    assert jnp.allclose(out2, ref, atol=5e-2, rtol=5e-2), f"max abs err {err2}"

    print("KERNEL_OK")
</pallas_src>

<mosaic_0001>
module attributes {stable_mosaic.version = 11 : i64} {
  func.func @ncf_kernel(%arg0: i32, %arg1: memref<512x64xf32, #tpu.memory_space<vmem>>, %arg2: memref<512x64xf32, #tpu.memory_space<vmem>>, %arg3: memref<64x128xbf16, #tpu.memory_space<vmem>>, %arg4: memref<64x128xbf16, #tpu.memory_space<vmem>>, %arg5: memref<1x128xf32, #tpu.memory_space<vmem>>, %arg6: memref<128x64xbf16, #tpu.memory_space<vmem>>, %arg7: memref<1x64xf32, #tpu.memory_space<vmem>>, %arg8: memref<64x32xbf16, #tpu.memory_space<vmem>>, %arg9: memref<1x32xf32, #tpu.memory_space<vmem>>, %arg10: memref<8x32xf32, #tpu.memory_space<vmem>>, %arg11: memref<8x64xf32, #tpu.memory_space<vmem>>, %arg12: memref<1x1xf32, #tpu.memory_space<vmem>>, %arg13: memref<1x512xf32, #tpu.memory_space<vmem>>) attributes {dimension_semantics = [#tpu.dimension_semantics<parallel>], iteration_bounds = array<i64: 1>, scalar_prefetch = 0 : i64, scratch_operands = 0 : i64, tpu.core_type = #tpu.core_type<tc>, window_params = [{transform_indices = @transform_0, window_bounds = array<i64: 512, 64>}, {transform_indices = @transform_1, window_bounds = array<i64: 512, 64>}, {pipeline_mode = #tpu.pipeline_mode<synchronous>, transform_indices = @transform_2, window_bounds = array<i64: 64, 128>}, {pipeline_mode = #tpu.pipeline_mode<synchronous>, transform_indices = @transform_3, window_bounds = array<i64: 64, 128>}, {pipeline_mode = #tpu.pipeline_mode<synchronous>, transform_indices = @transform_4, window_bounds = array<i64: 1, 128>}, {pipeline_mode = #tpu.pipeline_mode<synchronous>, transform_indices = @transform_5, window_bounds = array<i64: 128, 64>}, {pipeline_mode = #tpu.pipeline_mode<synchronous>, transform_indices = @transform_6, window_bounds = array<i64: 1, 64>}, {pipeline_mode = #tpu.pipeline_mode<synchronous>, transform_indices = @transform_7, window_bounds = array<i64: 64, 32>}, {pipeline_mode = #tpu.pipeline_mode<synchronous>, transform_indices = @transform_8, window_bounds = array<i64: 1, 32>}, {pipeline_mode = #tpu.pipeline_mode<synchronous>, transform_indices = @transform_9, window_bounds = array<i64: 8, 32>}, {pipeline_mode = #tpu.pipeline_mode<synchronous>, transform_indices = @transform_10, window_bounds = array<i64: 8, 64>}, {pipeline_mode = #tpu.pipeline_mode<synchronous>, transform_indices = @transform_11, window_bounds = array<i64: 1, 1>}, {transform_indices = @transform_12, window_bounds = array<i64: 1, 512>}]} {
    %c0 = arith.constant 0 : index
    %c0_0 = arith.constant 0 : index
    %0 = vector.load %arg1[%c0, %c0_0] : memref<512x64xf32, #tpu.memory_space<vmem>>, vector<512x64xf32>
    %c0_1 = arith.constant 0 : index
    %c0_2 = arith.constant 0 : index
    %1 = vector.load %arg2[%c0_1, %c0_2] : memref<512x64xf32, #tpu.memory_space<vmem>>, vector<512x64xf32>
    %2 = arith.truncf %0 : vector<512x64xf32> to vector<512x64xbf16>
    %c0_3 = arith.constant 0 : index
    %c0_4 = arith.constant 0 : index
    %3 = vector.load %arg3[%c0_3, %c0_4] : memref<64x128xbf16, #tpu.memory_space<vmem>>, vector<64x128xbf16>
    %cst = arith.constant dense<0.000000e+00> : vector<512x128xf32>
    %4 = tpu.matmul %2, %3, %cst {dimension_numbers = #tpu.dot_dimension_numbers<[1], [0], [0], [1], [0, 0, 1, 1], [], []>} : vector<512x64xbf16>, vector<64x128xbf16>, vector<512x128xf32> -> vector<512x128xf32>
    %5 = arith.truncf %1 : vector<512x64xf32> to vector<512x64xbf16>
    %c0_5 = arith.constant 0 : index
    %c0_6 = arith.constant 0 : index
    %6 = vector.load %arg4[%c0_5, %c0_6] : memref<64x128xbf16, #tpu.memory_space<vmem>>, vector<64x128xbf16>
    %cst_7 = arith.constant dense<0.000000e+00> : vector<512x128xf32>
    %7 = tpu.matmul %5, %6, %cst_7 {dimension_numbers = #tpu.dot_dimension_numbers<[1], [0], [0], [1], [0, 0, 1, 1], [], []>} : vector<512x64xbf16>, vector<64x128xbf16>, vector<512x128xf32> -> vector<512x128xf32>
    %8 = arith.addf %4, %7 : vector<512x128xf32>
    %c0_8 = arith.constant 0 : index
    %c0_9 = arith.constant 0 : index
    %9 = vector.load %arg5[%c0_8, %c0_9] : memref<1x128xf32, #tpu.memory_space<vmem>>, vector<1x128xf32>
    %10 = vector.broadcast %9 : vector<1x128xf32> to vector<512x128xf32>
    %11 = arith.addf %8, %10 : vector<512x128xf32>
    %cst_10 = arith.constant 0.000000e+00 : f32
    %12 = vector.broadcast %cst_10 : f32 to vector<512x128xf32>
    %13 = arith.maximumf %11, %12 : vector<512x128xf32>
    %14 = arith.truncf %13 : vector<512x128xf32> to vector<512x128xbf16>
    %c0_11 = arith.constant 0 : index
    %c0_12 = arith.constant 0 : index
    %15 = vector.load %arg6[%c0_11, %c0_12] : memref<128x64xbf16, #tpu.memory_space<vmem>>, vector<128x64xbf16>
    %cst_13 = arith.constant dense<0.000000e+00> : vector<512x64xf32>
    %16 = tpu.matmul %14, %15, %cst_13 {dimension_numbers = #tpu.dot_dimension_numbers<[1], [0], [0], [1], [0, 0, 1, 1], [], []>} : vector<512x128xbf16>, vector<128x64xbf16>, vector<512x64xf32> -> vector<512x64xf32>
    %c0_14 = arith.constant 0 : index
    %c0_15 = arith.constant 0 : index
    %17 = vector.load %arg7[%c0_14, %c0_15] : memref<1x64xf32, #tpu.memory_space<vmem>>, vector<1x64xf32>
    %18 = vector.broadcast %17 : vector<1x64xf32> to vector<512x64xf32>
    %19 = arith.addf %16, %18 : vector<512x64xf32>
    %cst_16 = arith.constant 0.000000e+00 : f32
    %20 = vector.broadcast %cst_16 : f32 to vector<512x64xf32>
    %21 = arith.maximumf %19, %20 : vector<512x64xf32>
    %22 = arith.truncf %21 : vector<512x64xf32> to vector<512x64xbf16>
    %c0_17 = arith.constant 0 : index
    %c0_18 = arith.constant 0 : index
    %23 = vector.load %arg8[%c0_17, %c0_18] : memref<64x32xbf16, #tpu.memory_space<vmem>>, vector<64x32xbf16>
    %cst_19 = arith.constant dense<0.000000e+00> : vector<512x32xf32>
    %24 = tpu.matmul %22, %23, %cst_19 {dimension_numbers = #tpu.dot_dimension_numbers<[1], [0], [0], [1], [0, 0, 1, 1], [], []>} : vector<512x64xbf16>, vector<64x32xbf16>, vector<512x32xf32> -> vector<512x32xf32>
    %c0_20 = arith.constant 0 : index
    %c0_21 = arith.constant 0 : index
    %25 = vector.load %arg9[%c0_20, %c0_21] : memref<1x32xf32, #tpu.memory_space<vmem>>, vector<1x32xf32>
    %26 = vector.broadcast %25 : vector<1x32xf32> to vector<512x32xf32>
    %27 = arith.addf %24, %26 : vector<512x32xf32>
    %cst_22 = arith.constant 0.000000e+00 : f32
    %28 = vector.broadcast %cst_22 : f32 to vector<512x32xf32>
    %29 = arith.maximumf %27, %28 : vector<512x32xf32>
    %30 = arith.mulf %0, %1 : vector<512x64xf32>
    %c0_23 = arith.constant 0 : index
    %c0_24 = arith.constant 0 : index
    %31 = vector.load %arg10[%c0_23, %c0_24] : memref<8x32xf32, #tpu.memory_space<vmem>>, vector<8x32xf32>
    %cst_25 = arith.constant dense<0.000000e+00> : vector<8x512xf32>
    %32 = tpu.matmul %31, %29, %cst_25 {dimension_numbers = #tpu.dot_dimension_numbers<[1], [1], [0], [0], [0, 0, 1, 0], [], []>} : vector<8x32xf32>, vector<512x32xf32>, vector<8x512xf32> -> vector<8x512xf32>
    %c0_26 = arith.constant 0 : index
    %c0_27 = arith.constant 0 : index
    %33 = vector.load %arg11[%c0_26, %c0_27] : memref<8x64xf32, #tpu.memory_space<vmem>>, vector<8x64xf32>
    %cst_28 = arith.constant dense<0.000000e+00> : vector<8x512xf32>
    %34 = tpu.matmul %33, %30, %cst_28 {dimension_numbers = #tpu.dot_dimension_numbers<[1], [1], [0], [0], [0, 0, 1, 0], [], []>} : vector<8x64xf32>, vector<512x64xf32>, vector<8x512xf32> -> vector<8x512xf32>
    %35 = arith.addf %32, %34 : vector<8x512xf32>
    %36 = vector.extract_strided_slice %35 {offsets = [0, 0], sizes = [1, 512], strides = [1, 1]} : vector<8x512xf32> to vector<1x512xf32>
    %c0_29 = arith.constant 0 : index
    %c0_30 = arith.constant 0 : index
    %37 = vector.load %arg12[%c0_29, %c0_30] : memref<1x1xf32, #tpu.memory_space<vmem>>, vector<1x1xf32>
    %38 = vector.broadcast %37 : vector<1x1xf32> to vector<1x512xf32>
    %39 = arith.addf %36, %38 : vector<1x512xf32>
    %c0_31 = arith.constant 0 : index
    %c0_32 = arith.constant 0 : index
    %40 = vector.load %arg13[%c0_31, %c0_32] : memref<1x512xf32, #tpu.memory_space<vmem>>, vector<1x512xf32>
    tpu.vector_store %arg13[%c0_31, %c0_32], %39 {strides = array<i32>} : memref<1x512xf32, #tpu.memory_space<vmem>>, vector<1x512xf32>,
    return
  }
  func.func @transform_0(%arg0: i32) -> (i32, i32) {
    %c0_i32 = arith.constant 0 : i32
    %c0_i32_0 = arith.constant 0 : i32
    return %arg0, %c0_i32 : i32, i32
  }
  func.func @transform_1(%arg0: i32) -> (i32, i32) {
    %c0_i32 = arith.constant 0 : i32
    %c0_i32_0 = arith.constant 0 : i32
    return %arg0, %c0_i32 : i32, i32
  }
  func.func @transform_2(%arg0: i32) -> (i32, i32) {
    %c0_i32 = arith.constant 0 : i32
    %c0_i32_0 = arith.constant 0 : i32
    %c0_i32_1 = arith.constant 0 : i32
    return %c0_i32, %c0_i32_0 : i32, i32
  }
  func.func @transform_3(%arg0: i32) -> (i32, i32) {
    %c0_i32 = arith.constant 0 : i32
    %c0_i32_0 = arith.constant 0 : i32
    %c0_i32_1 = arith.constant 0 : i32
    return %c0_i32, %c0_i32_0 : i32, i32
  }
  func.func @transform_4(%arg0: i32) -> (i32, i32) {
    %c0_i32 = arith.constant 0 : i32
    %c0_i32_0 = arith.constant 0 : i32
    %c0_i32_1 = arith.constant 0 : i32
    return %c0_i32, %c0_i32_0 : i32, i32
  }
  func.func @transform_5(%arg0: i32) -> (i32, i32) {
    %c0_i32 = arith.constant 0 : i32
    %c0_i32_0 = arith.constant 0 : i32
    %c0_i32_1 = arith.constant 0 : i32
    return %c0_i32, %c0_i32_0 : i32, i32
  }
  func.func @transform_6(%arg0: i32) -> (i32, i32) {
    %c0_i32 = arith.constant 0 : i32
    %c0_i32_0 = arith.constant 0 : i32
    %c0_i32_1 = arith.constant 0 : i32
    return %c0_i32, %c0_i32_0 : i32, i32
  }
  func.func @transform_7(%arg0: i32) -> (i32, i32) {
    %c0_i32 = arith.constant 0 : i32
    %c0_i32_0 = arith.constant 0 : i32
    %c0_i32_1 = arith.constant 0 : i32
    return %c0_i32, %c0_i32_0 : i32, i32
  }
  func.func @transform_8(%arg0: i32) -> (i32, i32) {
    %c0_i32 = arith.constant 0 : i32
    %c0_i32_0 = arith.constant 0 : i32
    %c0_i32_1 = arith.constant 0 : i32
    return %c0_i32, %c0_i32_0 : i32, i32
  }
  func.func @transform_9(%arg0: i32) -> (i32, i32) {
    %c0_i32 = arith.constant 0 : i32
    %c0_i32_0 = arith.constant 0 : i32
    %c0_i32_1 = arith.constant 0 : i32
    return %c0_i32, %c0_i32_0 : i32, i32
  }
  func.func @transform_10(%arg0: i32) -> (i32, i32) {
    %c0_i32 = arith.constant 0 : i32
    %c0_i32_0 = arith.constant 0 : i32
    %c0_i32_1 = arith.constant 0 : i32
    return %c0_i32, %c0_i32_0 : i32, i32
  }
  func.func @transform_11(%arg0: i32) -> (i32, i32) {
    %c0_i32 = arith.constant 0 : i32
    %c0_i32_0 = arith.constant 0 : i32
    %c0_i32_1 = arith.constant 0 : i32
    return %c0_i32, %c0_i32_0 : i32, i32
  }
  func.func @transform_12(%arg0: i32) -> (i32, i32) {
    %c0_i32 = arith.constant 0 : i32
    %c0_i32_0 = arith.constant 0 : i32
    return %c0_i32, %arg0 : i32, i32
  }
}

</mosaic_0001>

<bundles_post_ra>
// kernel: tpu_custom_call.1
= control target key start
LH: loop header
LB: loop body
LE: loop exit
PB: predicated region body
PF: predicated region fallthrough
CT: control target
= control target key end

     0   :  { %s4326_s0 = inlined_call_operand.vmem [shape: f32[512,64], index: 0, kind: input, shape index: {}]   ;;  %s4327_s1 = inlined_call_operand.vmem [shape: f32[512,64], index: 1, kind: input, shape index: {}]   ;;  %s4328_s2 = inlined_call_operand.vmem [shape: bf16[64,128], index: 2, kind: input, shape index: {}]   ;;  %s4329_s3 = inlined_call_operand.vmem [shape: bf16[64,128], index: 3, kind: input, shape index: {}]   ;;  %s4330_s4 = inlined_call_operand.vmem [shape: f32[1,128], index: 4, kind: input, shape index: {}]   ;;  %s4331_s5 = inlined_call_operand.vmem [shape: bf16[128,64], index: 5, kind: input, shape index: {}]   ;;  %s4332_s6 = inlined_call_operand.vmem [shape: f32[1,64], index: 6, kind: input, shape index: {}]   ;;  %s4333_s7 = inlined_call_operand.vmem [shape: bf16[64,32], index: 7, kind: input, shape index: {}]   ;;  %s4334_s8 = inlined_call_operand.vmem [shape: f32[1,32], index: 8, kind: input, shape index: {}]   ;;  %s4335_s9 = inlined_call_operand.vmem [shape: f32[8,32], index: 9, kind: input, shape index: {}]   ;;  %s4336_s10 = inlined_call_operand.vmem [shape: f32[8,64], index: 10, kind: input, shape index: {}]   ;;  %s4337_s11 = inlined_call_operand.<no memory space> [shape: f32[1,1], index: 11, kind: input, shape index: {}]   ;;  %s4338_s12 = inlined_call_operand.hbm [shape: f32[1,512], index: 12, kind: output, shape index: {}]  }
   0x1   :  { %v17_v0 = vstv %s4337_s11 }
   0x2   :  { %18 = vst [vmem:[#allocation2] sm:$0x1] %v17_v0 }
   0x3   :  { %v2676_v1 = vld [vmem:[%s4329_s3 + $0x18] sm:$0xff]  ;;  %v2675_v3 = vld [vmem:[%s4329_s3 + $0x10] sm:$0xff]  ;;  %v2674_v5 = vld [vmem:[%s4329_s3 + $0x8] sm:$0xff] }
   0x4   :  { %v2672_v2 = vld [vmem:[%s4328_s2 + $0x18] sm:$0xff]  ;;  %378 = vmatpush.bf16.msra.mxu0 %v2676_v1  ;;  %v2671_v4 = vld [vmem:[%s4328_s2 + $0x10] sm:$0xff]  ;;  %v2670_v6 = vld [vmem:[%s4328_s2 + $0x8] sm:$0xff] }
   0x5   :  { %667 = vmatpush.bf16.msra.mxu1 %v2672_v2 }
   0x8   :  { %379 = vmatpush.bf16.msra.mxu0 %v2675_v3 }
   0x9   :  { %668 = vmatpush.bf16.msra.mxu1 %v2671_v4 }
   0xa   :  { %19 = vsyncpa [#allocation4], 0  ;;  %v2673_v7 = vld [vmem:[%s4329_s3] sm:$0xff]  ;;  %v110_v10 = vld [vmem:[%s4327_s1 + $0x8] sm:$0xff]  ;;  %vm277_vm0 = vcmask 523264   ;;  %vm2035_vm1 = vcmask 261120  }
   0xb   :  { %v2669_v8 = vld [vmem:[%s4328_s2] sm:$0xff]  ;;  %v46_v12 = vld [vmem:[%s4326_s0 + $0x8] sm:$0xff]  ;;  %v111_v15 = vld [vmem:[%s4327_s1 + $0x10] sm:$0xff]  ;;  %vm2329_vm2 = vcmask 1040384   ;;  %vm2331_vm3 = vcmask 1042434   ;;  %s2348_s23 = sshll.u32 %s4338_s12, 4  ;;  %s2349_s23 = int_to_ptr.hbm [resolvable:$true] %s2348_s23 }
   0xc   :  { %v109_v9 = vld [vmem:[%s4327_s1] sm:$0xff]  ;;  %380 = vmatpush.bf16.msra.mxu0 %v2674_v5  ;;  %v112_v16 = vld [vmem:[%s4327_s1 + $0x18] sm:$0xff]  ;;  %v47_v17 = vld [vmem:[%s4326_s0 + $0x10] sm:$0xff]  ;;  %vm2333_vm4 = vcmask 1041408  }
   0xd   :  { %669 = vmatpush.bf16.msra.mxu1 %v2670_v6  ;;  %v45_v11 = vld [vmem:[%s4326_s0] sm:$0xff]  ;;  %v213_v13 = vpack.c.bf16 %v110_v10, %v109_v9  ;;  %v48_v18 = vld [vmem:[%s4326_s0 + $0x18] sm:$0xff]  ;;  %v214_v19 = vpack.c.bf16 %v112_v16, %v111_v15  ;;  %v114_v22 = vld [vmem:[%s4327_s1 + $0x28] sm:$0xff] }
   0xe   :  { %v173_v14 = vpack.c.bf16 %v46_v12, %v45_v11  ;;  %v174_v20 = vpack.c.bf16 %v48_v18, %v47_v17  ;;  %v113_v21 = vld [vmem:[%s4327_s1 + $0x20] sm:$0xff]  ;;  %v50_v24 = vld [vmem:[%s4326_s0 + $0x28] sm:$0xff]  ;;  %v115_v27 = vld [vmem:[%s4327_s1 + $0x30] sm:$0xff] }
   0xf   :  { %v49_v23 = vld [vmem:[%s4326_s0 + $0x20] sm:$0xff]  ;;  %v215_v25 = vpack.c.bf16 %v114_v22, %v113_v21  ;;  %v116_v28 = vld [vmem:[%s4327_s1 + $0x38] sm:$0xff]  ;;  %v51_v29 = vld [vmem:[%s4326_s0 + $0x30] sm:$0xff] }
  0x10   :  { %381 = vmatpush.bf16.msra.mxu0 %v2673_v7  ;;  %v175_v26 = vpack.c.bf16 %v50_v24, %v49_v23  ;;  %v52_v30 = vld [vmem:[%s4326_s0 + $0x38] sm:$0xff]  ;;  %v216_v31 = vpack.c.bf16 %v116_v28, %v115_v27  ;;  %v117_v33 = vld [vmem:[%s4327_s1 + $0x40] sm:$0xff]  ;;  %v118_v34 = vld [vmem:[%s4327_s1 + $0x48] sm:$0xff] }
  0x11   :  { %670 = vmatpush.bf16.msra.mxu1 %v2669_v8  ;;  %v176_v32 = vpack.c.bf16 %v52_v30, %v51_v29  ;;  %v53_v35 = vld [vmem:[%s4326_s0 + $0x40] sm:$0xff]  ;;  %v54_v36 = vld [vmem:[%s4326_s0 + $0x48] sm:$0xff]  ;;  %v217_v37 = vpack.c.bf16 %v118_v34, %v117_v33  ;;  %v2684_v39 = vld [vmem:[%s4331_s5 + $0x38] sm:$0xff] }
  0x12   :  { %v177_v38 = vpack.c.bf16 %v54_v36, %v53_v35  ;;  %1064 = vmatpush.bf16.msra.mxu2 %v2684_v39  ;;  %v119_v40 = vld [vmem:[%s4327_s1 + $0x50] sm:$0xff]  ;;  %v120_v41 = vld [vmem:[%s4327_s1 + $0x58] sm:$0xff]  ;;  %v2682_v47 = vld [vmem:[%s4331_s5 + $0x28] sm:$0xff] }
  0x13   :  { %2373 = vmatmul.msk.bf16.vlgmr.msra.gmra.mxu0 %vm277_vm0, %v213_v13  ;;  %v55_v42 = vld [vmem:[%s4326_s0 + $0x50] sm:$0xff]  ;;  %v56_v43 = vld [vmem:[%s4326_s0 + $0x58] sm:$0xff]  ;;  %v218_v44 = vpack.c.bf16 %v120_v41, %v119_v40  ;;  %v2681_v48 = vld [vmem:[%s4331_s5 + $0x20] sm:$0xff] }
  0x14   :  { %2421 = vmatmul.msk.bf16.vlgmr.msra.gmra.mxu1 %vm277_vm0, %v173_v14  ;;  %v178_v45 = vpack.c.bf16 %v56_v43, %v55_v42  ;;  %v2683_v46 = vld [vmem:[%s4331_s5 + $0x30] sm:$0xff]  ;;  %v121_v49 = vld [vmem:[%s4327_s1 + $0x60] sm:$0xff]  ;;  %v122_v50 = vld [vmem:[%s4327_s1 + $0x68] sm:$0xff] }
  0x15   :  { %v57_v51 = vld [vmem:[%s4326_s0 + $0x60] sm:$0xff]  ;;  %v58_v52 = vld [vmem:[%s4326_s0 + $0x68] sm:$0xff]  ;;  %v219_v53 = vpack.c.bf16 %v122_v50, %v121_v49  ;;  %v2680_v55 = vld [vmem:[%s4331_s5 + $0x18] sm:$0xff] }
  0x16   :  { %1065 = vmatpush.bf16.msra.mxu2 %v2683_v46  ;;  %v179_v54 = vpack.c.bf16 %v58_v52, %v57_v51  ;;  %v2679_v56 = vld [vmem:[%s4331_s5 + $0x10] sm:$0xff]  ;;  %v2678_v57 = vld [vmem:[%s4331_s5 + $0x8] sm:$0xff]  ;;  %v2677_v59 = vld [vmem:[%s4331_s5] sm:$0xff] }
  0x17   :  { %v123_v58 = vld [vmem:[%s4327_s1 + $0x70] sm:$0xff]  ;;  %v124_v60 = vld [vmem:[%s4327_s1 + $0x78] sm:$0xff]  ;;  %v125_v1 = vld [vmem:[%s4327_s1 + $0x80] sm:$0xff] }
  0x18   :  { %v59_v61 = vld [vmem:[%s4326_s0 + $0x70] sm:$0xff]  ;;  %v60_v62 = vld [vmem:[%s4326_s0 + $0x78] sm:$0xff]  ;;  %v220_v63 = vpack.c.bf16 %v124_v60, %v123_v58  ;;  %v126_v2 = vld [vmem:[%s4327_s1 + $0x88] sm:$0xff] }
  0x19   :  { %v180_v0 = vpack.c.bf16 %v60_v62, %v59_v61  ;;  %v61_v3 = vld [vmem:[%s4326_s0 + $0x80] sm:$0xff]  ;;  %v62_v4 = vld [vmem:[%s4326_s0 + $0x88] sm:$0xff]  ;;  %v221_v5 = vpack.c.bf16 %v126_v2, %v125_v1  ;;  %v127_v16 = vld [vmem:[%s4327_s1 + $0x90] sm:$0xff] }
  0x1a   :  { %1066 = vmatpush.bf16.msra.mxu2 %v2682_v47  ;;  %v181_v6 = vpack.c.bf16 %v62_v4, %v61_v3  ;;  %v3069_v10 = vld [vmem:[%s4330_s4] ss:$0 sm:$0xff]  ;;  %v128_v17 = vld [vmem:[%s4327_s1 + $0x98] sm:$0xff]  ;;  %v63_v18 = vld [vmem:[%s4326_s0 + $0x90] sm:$0xff] }
  0x1b   :  { %v222_v23 = vpack.c.bf16 %v128_v17, %v127_v16  ;;  %v129_v33 = vld [vmem:[%s4327_s1 + $0xa0] sm:$0xff]  ;;  %v130_v34 = vld [vmem:[%s4327_s1 + $0xa8] sm:$0xff]  ;;  %v131_v50 = vld [vmem:[%s4327_s1 + $0xb0] sm:$0xff] }
  0x1c   :  { %v65_v35 = vld [vmem:[%s4326_s0 + $0xa0] sm:$0xff]  ;;  %v66_v36 = vld [vmem:[%s4326_s0 + $0xa8] sm:$0xff]  ;;  %v223_v40 = vpack.c.bf16 %v130_v34, %v129_v33  ;;  %v132_v51 = vld [vmem:[%s4327_s1 + $0xb8] sm:$0xff] }
  0x1d   :  { %v183_v41 = vpack.c.bf16 %v66_v36, %v65_v35  ;;  %v67_v52 = vld [vmem:[%s4326_s0 + $0xb0] sm:$0xff]  ;;  %v133_v3 = vld [vmem:[%s4327_s1 + $0xc0] sm:$0xff]  ;;  %v134_v4 = vld [vmem:[%s4327_s1 + $0xc8] sm:$0xff] }
  0x1e   :  { %1067 = vmatpush.bf16.msra.mxu2 %v2681_v48 }
  0x22   :  { %1068 = vmatpush.bf16.msra.mxu2 %v2680_v55 }
  0x23   :  { %2374 = vmatmul.msk.bf16.gmra.mxu0 %vm277_vm0, %v214_v19  ;;  %v64_v19 = vld [vmem:[%s4326_s0 + $0x98] sm:$0xff] }
  0x24   :  { %2422 = vmatmul.msk.bf16.gmra.mxu1 %vm277_vm0, %v174_v20  ;;  %v182_v24 = vpack.c.bf16 %v64_v19, %v63_v18 }
  0x26   :  { %1069 = vmatpush.bf16.msra.mxu2 %v2679_v56 }
  0x2a   :  { %1070 = vmatpush.bf16.msra.mxu2 %v2678_v57  ;;  %v224_v57 = vpack.c.bf16 %v132_v51, %v131_v50 }
  0x2e   :  { %1071 = vmatpush.bf16.msra.mxu2 %v2677_v59 }
  0x33   :  { %2375 = vmatmul.msk.bf16.gmra.mxu0 %vm277_vm0, %v215_v25 }
  0x34   :  { %2423 = vmatmul.msk.bf16.gmra.mxu1 %vm277_vm0, %v175_v26 }
  0x43   :  { %2376 = vmatmul.msk.bf16.gmra.mxu0 %vm277_vm0, %v216_v31 }
  0x44   :  { %2424 = vmatmul.msk.bf16.gmra.mxu1 %vm277_vm0, %v176_v32 }
  0x53   :  { %2377 = vmatmul.msk.bf16.gmra.mxu0 %vm277_vm0, %v217_v37 }
  0x54   :  { %2425 = vmatmul.msk.bf16.gmra.mxu1 %vm277_vm0, %v177_v38 }
  0x63   :  { %2378 = vmatmul.msk.bf16.gmra.mxu0 %vm277_vm0, %v218_v44 }
  0x64   :  { %2426 = vmatmul.msk.bf16.gmra.mxu1 %vm277_vm0, %v178_v45 }
  0x73   :  { %2379 = vmatmul.msk.bf16.gmra.mxu0 %vm277_vm0, %v219_v53  ;;  %v68_v53 = vld [vmem:[%s4326_s0 + $0xb8] sm:$0xff] }
  0x74   :  { %2427 = vmatmul.msk.bf16.gmra.mxu1 %vm277_vm0, %v179_v54  ;;  %v184_v58 = vpack.c.bf16 %v68_v53, %v67_v52 }
  0x83   :  { %2380 = vmatmul.msk.bf16.gmra.mxu0 %vm277_vm0, %v220_v63 }
  0x84   :  { %2428 = vmatmul.msk.bf16.gmra.mxu1 %vm277_vm0, %v180_v0 }
  0x90   :  { %v383_v7 = vpop.f32.mrf.mxu0 }
  0x91   :  { %v672_v8 = vpop.f32.mrf.mxu1 }
  0x92   :  { %v673_v9 = vadd.f32 %v672_v8, %v383_v7 }
  0x93   :  { %2381 = vmatmul.msk.bf16.gmra.mxu0 %vm277_vm0, %v221_v5  ;;  %v69_v5 = vld [vmem:[%s4326_s0 + $0xc0] sm:$0xff] }
  0x94   :  { %2429 = vmatmul.msk.bf16.gmra.mxu1 %vm277_vm0, %v181_v6  ;;  %v836_v13 = vadd.f32 %v3069_v10, %v673_v9  ;;  %v70_v6 = vld [vmem:[%s4326_s0 + $0xc8] sm:$0xff] }
  0x96   :  { %v900_v20 = vmax.f32 %v836_v13, 0.0 }
  0x98   :  { %v385_v11 = vpop.f32.mrf.mxu0 }
  0x99   :  { %v674_v12 = vpop.f32.mrf.mxu1 }
  0x9a   :  { %v675_v14 = vadd.f32 %v674_v12, %v385_v11  ;;  %v225_v11 = vpack.c.bf16 %v134_v4, %v133_v3  ;;  %v185_v12 = vpack.c.bf16 %v70_v6, %v69_v5  ;;  %v2687_v4 = vld [vmem:[%s4333_s7 + $0x10] sm:$0xff] }
  0x9c   :  { %v837_v15 = vadd.f32 %v3069_v10, %v675_v14 }
  0x9e   :  { %v901_v21 = vmax.f32 %v837_v15, 0.0 }
  0xa0   :  { %v964_v22 = vpack.c.bf16 %v901_v21, %v900_v20  ;;  %v388_v25 = vpop.f32.mrf.mxu0  ;;  %v135_v21 = vld [vmem:[%s4327_s1 + $0xd0] sm:$0xff] }
  0xa1   :  { %v677_v26 = vpop.f32.mrf.mxu1 }
  0xa2   :  { %1072 = vmatmul.bf16.vlgmr.msra.gmra.mxu2 %v964_v22  ;;  %v678_v27 = vadd.f32 %v677_v26, %v388_v25  ;;  %v136_v22 = vld [vmem:[%s4327_s1 + $0xd8] sm:$0xff] }
  0xa3   :  { %2382 = vmatmul.msk.bf16.gmra.mxu0 %vm277_vm0, %v222_v23  ;;  %v71_v23 = vld [vmem:[%s4326_s0 + $0xd0] sm:$0xff] }
  0xa4   :  { %2430 = vmatmul.msk.bf16.gmra.mxu1 %vm277_vm0, %v182_v24  ;;  %v838_v30 = vadd.f32 %v3069_v10, %v678_v27  ;;  %v72_v24 = vld [vmem:[%s4326_s0 + $0xd8] sm:$0xff] }
  0xa6   :  { %v902_v37 = vmax.f32 %v838_v30, 0.0 }
  0xa8   :  { %v390_v28 = vpop.f32.mrf.mxu0 }
  0xa9   :  { %v679_v29 = vpop.f32.mrf.mxu1 }
  0xaa   :  { %v680_v31 = vadd.f32 %v679_v29, %v390_v28  ;;  %v226_v28 = vpack.c.bf16 %v136_v22, %v135_v21  ;;  %v186_v29 = vpack.c.bf16 %v72_v24, %v71_v23 }
  0xac   :  { %v839_v32 = vadd.f32 %v3069_v10, %v680_v31 }
  0xae   :  { %v903_v38 = vmax.f32 %v839_v32, 0.0 }
  0xb0   :  { %v965_v39 = vpack.c.bf16 %v903_v38, %v902_v37  ;;  %v393_v42 = vpop.f32.mrf.mxu0  ;;  %v137_v38 = vld [vmem:[%s4327_s1 + $0xe0] sm:$0xff] }
  0xb1   :  { %v682_v43 = vpop.f32.mrf.mxu1 }
  0xb2   :  { %1077 = vmatmul.bf16.gmra.mxu2 %v965_v39  ;;  %v683_v44 = vadd.f32 %v682_v43, %v393_v42  ;;  %v138_v39 = vld [vmem:[%s4327_s1 + $0xe8] sm:$0xff] }
  0xb3   :  { %2383 = vmatmul.msk.bf16.gmra.mxu0 %vm277_vm0, %v223_v40  ;;  %v73_v40 = vld [vmem:[%s4326_s0 + $0xe0] sm:$0xff] }
  0xb4   :  { %2431 = vmatmul.msk.bf16.gmra.mxu1 %vm277_vm0, %v183_v41  ;;  %v840_v47 = vadd.f32 %v3069_v10, %v683_v44  ;;  %v74_v41 = vld [vmem:[%s4326_s0 + $0xe8] sm:$0xff] }
  0xb6   :  { %v904_v54 = vmax.f32 %v840_v47, 0.0 }
  0xb8   :  { %v395_v45 = vpop.f32.mrf.mxu0 }
  0xb9   :  { %v684_v46 = vpop.f32.mrf.mxu1 }
  0xba   :  { %v685_v48 = vadd.f32 %v684_v46, %v395_v45  ;;  %v227_v45 = vpack.c.bf16 %v138_v39, %v137_v38  ;;  %v187_v46 = vpack.c.bf16 %v74_v41, %v73_v40 }
  0xbc   :  { %v841_v49 = vadd.f32 %v3069_v10, %v685_v48 }
  0xbe   :  { %v905_v55 = vmax.f32 %v841_v49, 0.0 }
  0xc0   :  { %v966_v56 = vpack.c.bf16 %v905_v55, %v904_v54  ;;  %v398_v59 = vpop.f32.mrf.mxu0  ;;  %v3172_v55 = vld [vmem:[%s4327_s1 + $0xf0] sm:$0xff] }
  0xc1   :  { %v687_v60 = vpop.f32.mrf.mxu1 }
  0xc2   :  { %1082 = vmatmul.bf16.gmra.mxu2 %v966_v56  ;;  %v688_v61 = vadd.f32 %v687_v60, %v398_v59  ;;  %v3177_v56 = vld [vmem:[%s4327_s1 + $0xf8] sm:$0xff] }
  0xc3   :  { %2384 = vmatmul.msk.bf16.gmra.mxu0 %vm277_vm0, %v224_v57  ;;  %v3182_v57 = vld [vmem:[%s4326_s0 + $0xf0] sm:$0xff] }
  0xc4   :  { %2432 = vmatmul.msk.bf16.gmra.mxu1 %vm277_vm0, %v184_v58  ;;  %v842_v0 = vadd.f32 %v3069_v10, %v688_v61  ;;  %v3187_v58 = vld [vmem:[%s4326_s0 + $0xf8] sm:$0xff] }
  0xc6   :  { %v906_v7 = vmax.f32 %v842_v0, 0.0 }
  0xc8   :  { %v400_v62 = vpop.f32.mrf.mxu0 }
  0xc9   :  { %v689_v63 = vpop.f32.mrf.mxu1 }
  0xca   :  { %v690_v1 = vadd.f32 %v689_v63, %v400_v62  ;;  %v228_v62 = vpack.c.bf16 %v3177_v56, %v3172_v55  ;;  %v188_v63 = vpack.c.bf16 %v3187_v58, %v3182_v57 }
  0xcc   :  { %v843_v2 = vadd.f32 %v3069_v10, %v690_v1 }
  0xce   :  { %v907_v8 = vmax.f32 %v843_v2, 0.0  ;;  %v2688_v2 = vld [vmem:[%s4333_s7 + $0x18] sm:$0xff] }
  0xcf   :  { %1465 = vmatpush.bf16.msra.mxu3 %v2688_v2 }
  0xd0   :  { %v967_v9 = vpack.c.bf16 %v907_v8, %v906_v7  ;;  %v403_v13 = vpop.f32.mrf.mxu0 }
  0xd1   :  { %v692_v14 = vpop.f32.mrf.mxu1 }
  0xd2   :  { %1087 = vmatmul.bf16.gmra.mxu2 %v967_v9  ;;  %v693_v15 = vadd.f32 %v692_v14, %v403_v13  ;;  %v2686_v9 = vld [vmem:[%s4333_s7 + $0x8] sm:$0xff]  ;;  %v77_v14 = vld [vmem:[%s4326_s0 + $0x100] sm:$0xff] }
  0xd3   :  { %2385 = vmatmul.msk.bf16.gmra.mxu0 %vm277_vm0, %v225_v11  ;;  %1466 = vmatpush.bf16.msra.mxu3 %v2687_v4  ;;  %v142_v13 = vld [vmem:[%s4327_s1 + $0x108] sm:$0xff] }
  0xd4   :  { %2433 = vmatmul.msk.bf16.gmra.mxu1 %vm277_vm0, %v185_v12  ;;  %v844_v18 = vadd.f32 %v3069_v10, %v693_v15  ;;  %v141_v12 = vld [vmem:[%s4327_s1 + $0x100] sm:$0xff]  ;;  %v78_v15 = vld [vmem:[%s4326_s0 + $0x108] sm:$0xff] }
  0xd5   :  { %v189_v21 = vpack.c.bf16 %v78_v15, %v77_v14  ;;  %v147_v15 = vld [vmem:[%s4327_s1 + $0x130] sm:$0xff] }
  0xd6   :  { %v908_v25 = vmax.f32 %v844_v18, 0.0  ;;  %v2685_v18 = vld [vmem:[%s4333_s7] sm:$0xff] }
  0xd7   :  { %1467 = vmatpush.bf16.msra.mxu3 %v2686_v9 }
  0xd8   :  { %v405_v16 = vpop.f32.mrf.mxu0 }
  0xd9   :  { %v694_v17 = vpop.f32.mrf.mxu1 }
  0xda   :  { %v695_v19 = vadd.f32 %v694_v17, %v405_v16 }
  0xdb   :  { %1468 = vmatpush.bf16.msra.mxu3 %v2685_v18  ;;  %v83_v18 = vld [vmem:[%s4326_s0 + $0x130] sm:$0xff] }
  0xdc   :  { %v845_v20 = vadd.f32 %v3069_v10, %v695_v19 }
  0xde   :  { %v909_v26 = vmax.f32 %v845_v20, 0.0  ;;  %v229_v20 = vpack.c.bf16 %v142_v13, %v141_v12 }
  0xe0   :  { %v968_v27 = vpack.c.bf16 %v909_v26, %v908_v25  ;;  %v408_v30 = vpop.f32.mrf.mxu0 }
  0xe1   :  { %v697_v31 = vpop.f32.mrf.mxu1 }
  0xe2   :  { %1092 = vmatmul.bf16.gmra.mxu2 %v968_v27  ;;  %v698_v32 = vadd.f32 %v697_v31, %v408_v30  ;;  %v143_v30 = vld [vmem:[%s4327_s1 + $0x110] sm:$0xff]  ;;  %v144_v31 = vld [vmem:[%s4327_s1 + $0x118] sm:$0xff] }
  0xe3   :  { %2386 = vmatmul.msk.bf16.gmra.mxu0 %vm277_vm0, %v226_v28 }
  0xe4   :  { %2434 = vmatmul.msk.bf16.gmra.mxu1 %vm277_vm0, %v186_v29  ;;  %v846_v35 = vadd.f32 %v3069_v10, %v698_v32  ;;  %v79_v32 = vld [vmem:[%s4326_s0 + $0x110] sm:$0xff] }
  0xe6   :  { %v910_v42 = vmax.f32 %v846_v35, 0.0 }
  0xe8   :  { %v410_v33 = vpop.f32.mrf.mxu0 }
  0xe9   :  { %v699_v34 = vpop.f32.mrf.mxu1 }
  0xea   :  { %v700_v36 = vadd.f32 %v699_v34, %v410_v33  ;;  %v80_v33 = vld [vmem:[%s4326_s0 + $0x118] sm:$0xff] }
  0xeb   :  { %v190_v38 = vpack.c.bf16 %v80_v33, %v79_v32 }
  0xec   :  { %v847_v37 = vadd.f32 %v3069_v10, %v700_v36 }
  0xee   :  { %v911_v43 = vmax.f32 %v847_v37, 0.0  ;;  %v230_v37 = vpack.c.bf16 %v144_v31, %v143_v30 }
  0xf0   :  { %v969_v44 = vpack.c.bf16 %v911_v43, %v910_v42  ;;  %v413_v47 = vpop.f32.mrf.mxu0  ;;  %v3242_v43 = vld [vmem:[%s4332_s6] ss:$0 sm:$0xff] }
  0xf1   :  { %v702_v48 = vpop.f32.mrf.mxu1 }
  0xf2   :  { %1097 = vmatmul.bf16.gmra.mxu2 %v969_v44  ;;  %v703_v49 = vadd.f32 %v702_v48, %v413_v47 }
  0xf3   :  { %2387 = vmatmul.msk.bf16.gmra.mxu0 %vm277_vm0, %v227_v45 }
  0xf4   :  { %2435 = vmatmul.msk.bf16.gmra.mxu1 %vm277_vm0, %v187_v46  ;;  %v848_v52 = vadd.f32 %v3069_v10, %v703_v49 }
  0xf6   :  { %v912_v59 = vmax.f32 %v848_v52, 0.0 }
  0xf8   :  { %v415_v50 = vpop.f32.mrf.mxu0 }
  0xf9   :  { %v704_v51 = vpop.f32.mrf.mxu1 }
  0xfa   :  { %v705_v53 = vadd.f32 %v704_v51, %v415_v50  ;;  %v145_v50 = vld [vmem:[%s4327_s1 + $0x120] sm:$0xff]  ;;  %v146_v51 = vld [vmem:[%s4327_s1 + $0x128] sm:$0xff] }
  0xfc   :  { %v849_v54 = vadd.f32 %v3069_v10, %v705_v53  ;;  %v81_v53 = vld [vmem:[%s4326_s0 + $0x120] sm:$0xff] }
  0xfe   :  { %v913_v60 = vmax.f32 %v849_v54, 0.0  ;;  %v82_v54 = vld [vmem:[%s4326_s0 + $0x128] sm:$0xff] }
  0xff   :  { %v191_v2 = vpack.c.bf16 %v82_v54, %v81_v53 }
 0x100   :  { %v970_v61 = vpack.c.bf16 %v913_v60, %v912_v59  ;;  %v418_v0 = vpop.f32.mrf.mxu0 }
 0x101   :  { %v707_v1 = vpop.f32.mrf.mxu1 }
 0x102   :  { %1102 = vmatmul.bf16.gmra.mxu2 %v970_v61  ;;  %v708_v3 = vadd.f32 %v707_v1, %v418_v0 }
 0x103   :  { %2388 = vmatmul.msk.bf16.gmra.mxu0 %vm277_vm0, %v228_v62  ;;  %v231_v62 = vpack.c.bf16 %v146_v51, %v145_v50 }
 0x104   :  { %2436 = vmatmul.msk.bf16.gmra.mxu1 %vm277_vm0, %v188_v63  ;;  %v850_v7 = vadd.f32 %v3069_v10, %v708_v3 }
 0x106   :  { %v914_v16 = vmax.f32 %v850_v7, 0.0 }
 0x108   :  { %v420_v5 = vpop.f32.mrf.mxu0 }
 0x109   :  { %v709_v6 = vpop.f32.mrf.mxu1 }
 0x10a   :  { %v710_v8 = vadd.f32 %v709_v6, %v420_v5 }
 0x10c   :  { %v851_v11 = vadd.f32 %v3069_v10, %v710_v8 }
 0x10e   :  { %v915_v17 = vmax.f32 %v851_v11, 0.0 }
 0x110   :  { %v971_v19 = vpack.c.bf16 %v915_v17, %v914_v16  ;;  %v423_v22 = vpop.f32.mrf.mxu0  ;;  %v148_v16 = vld [vmem:[%s4327_s1 + $0x138] sm:$0xff] }
 0x111   :  { %v712_v23 = vpop.f32.mrf.mxu1 }
 0x112   :  { %1107 = vmatmul.bf16.gmra.mxu2 %v971_v19  ;;  %v713_v24 = vadd.f32 %v712_v23, %v423_v22  ;;  %v84_v19 = vld [vmem:[%s4326_s0 + $0x138] sm:$0xff]  ;;  %v232_v23 = vpack.c.bf16 %v148_v16, %v147_v15 }
 0x113   :  { %2389 = vmatmul.msk.bf16.gmra.mxu0 %vm277_vm0, %v229_v20 }
 0x114   :  { %2437 = vmatmul.msk.bf16.gmra.mxu1 %vm277_vm0, %v189_v21  ;;  %v852_v27 = vadd.f32 %v3069_v10, %v713_v24 }
 0x116   :  { %v916_v34 = vmax.f32 %v852_v27, 0.0  ;;  %v192_v27 = vpack.c.bf16 %v84_v19, %v83_v18 }
 0x118   :  { %v425_v25 = vpop.f32.mrf.mxu0 }
 0x119   :  { %v714_v26 = vpop.f32.mrf.mxu1 }
 0x11a   :  { %v715_v28 = vadd.f32 %v714_v26, %v425_v25 }
 0x11c   :  { %v853_v29 = vadd.f32 %v3069_v10, %v715_v28 }
 0x11e   :  { %v917_v35 = vmax.f32 %v853_v29, 0.0 }
 0x120   :  { %v972_v36 = vpack.c.bf16 %v917_v35, %v916_v34  ;;  %v428_v39 = vpop.f32.mrf.mxu0 }
 0x121   :  { %v717_v40 = vpop.f32.mrf.mxu1 }
 0x122   :  { %1112 = vmatmul.bf16.gmra.mxu2 %v972_v36  ;;  %v718_v42 = vadd.f32 %v717_v40, %v428_v39  ;;  %v149_v39 = vld [vmem:[%s4327_s1 + $0x140] sm:$0xff]  ;;  %v150_v40 = vld [vmem:[%s4327_s1 + $0x148] sm:$0xff] }
 0x123   :  { %2390 = vmatmul.msk.bf16.gmra.mxu0 %vm277_vm0, %v230_v37 }
 0x124   :  { %2438 = vmatmul.msk.bf16.gmra.mxu1 %vm277_vm0, %v190_v38  ;;  %v854_v46 = vadd.f32 %v3069_v10, %v718_v42  ;;  %v85_v42 = vld [vmem:[%s4326_s0 + $0x140] sm:$0xff] }
 0x125   :  { %v1073_v41 = vpop.f32.mrf.mxu2 }
 0x126   :  { %v1074_v48 = vadd.f32 %v3242_v43, %v1073_v41  ;;  %v918_v59 = vmax.f32 %v854_v46, 0.0 }
 0x128   :  { %v430_v44 = vpop.f32.mrf.mxu0  ;;  %v1233_v63 = vmax.f32 %v1074_v48, 0.0  ;;  %v233_v48 = vpack.c.bf16 %v150_v40, %v149_v39 }
 0x129   :  { %v719_v45 = vpop.f32.mrf.mxu1 }
 0x12a   :  { %v720_v47 = vadd.f32 %v719_v45, %v430_v44  ;;  %v86_v44 = vld [vmem:[%s4326_s0 + $0x148] sm:$0xff] }
 0x12c   :  { %v855_v49 = vadd.f32 %v3069_v10, %v720_v47 }
 0x12d   :  { %v1075_v52 = vpop.f32.mrf.mxu2 }
 0x12e   :  { %v1076_v60 = vadd.f32 %v3242_v43, %v1075_v52  ;;  %v919_v61 = vmax.f32 %v855_v49, 0.0  ;;  %v193_v52 = vpack.c.bf16 %v86_v44, %v85_v42 }
 0x130   :  { %v1234_v0 = vmax.f32 %v1076_v60, 0.0  ;;  %v973_v1 = vpack.c.bf16 %v919_v61, %v918_v59  ;;  %v433_v3 = vpop.f32.mrf.mxu0 }
 0x131   :  { %v722_v4 = vpop.f32.mrf.mxu1 }
 0x132   :  { %1117 = vmatmul.bf16.gmra.mxu2 %v973_v1  ;;  %v1297_v5 = vpack.c.bf16 %v1234_v0, %v1233_v63  ;;  %v723_v7 = vadd.f32 %v722_v4, %v433_v3  ;;  %v151_v4 = vld [vmem:[%s4327_s1 + $0x150] sm:$0xff] }
 0x133   :  { %2391 = vmatmul.msk.bf16.gmra.mxu0 %vm277_vm0, %v231_v62 }
 0x134   :  { %2439 = vmatmul.msk.bf16.gmra.mxu1 %vm277_vm0, %v191_v2  ;;  %2501 = vmatmul.msk.bf16.vlgmr.msra.gmra.mxu3 %vm277_vm0, %v1297_v5  ;;  %v856_v11 = vadd.f32 %v3069_v10, %v723_v7  ;;  %v3310_v5 = vld [vmem:[%s4327_s1 + $0x158] sm:$0xff]  ;;  %v87_v7 = vld [vmem:[%s4326_s0 + $0x150] sm:$0xff] }
 0x135   :  { %v1078_v6 = vpop.f32.mrf.mxu2 }
 0x136   :  { %v1079_v13 = vadd.f32 %v3242_v43, %v1078_v6  ;;  %v920_v20 = vmax.f32 %v856_v11, 0.0 }
 0x138   :  { %v435_v8 = vpop.f32.mrf.mxu0  ;;  %v1235_v24 = vmax.f32 %v1079_v13, 0.0  ;;  %v234_v13 = vpack.c.bf16 %v3310_v5, %v151_v4 }
 0x139   :  { %v724_v9 = vpop.f32.mrf.mxu1 }
 0x13a   :  { %v725_v12 = vadd.f32 %v724_v9, %v435_v8  ;;  %v3318_v8 = vld [vmem:[%s4326_s0 + $0x158] sm:$0xff] }
 0x13c   :  { %v857_v14 = vadd.f32 %v3069_v10, %v725_v12 }
 0x13d   :  { %v1080_v17 = vpop.f32.mrf.mxu2 }
 0x13e   :  { %v1081_v21 = vadd.f32 %v3242_v43, %v1080_v17  ;;  %v921_v22 = vmax.f32 %v857_v14, 0.0  ;;  %v194_v17 = vpack.c.bf16 %v3318_v8, %v87_v7 }
 0x140   :  { %v1236_v25 = vmax.f32 %v1081_v21, 0.0  ;;  %v974_v26 = vpack.c.bf16 %v921_v22, %v920_v20  ;;  %v438_v28 = vpop.f32.mrf.mxu0 }
 0x141   :  { %v727_v29 = vpop.f32.mrf.mxu1 }
 0x142   :  { %1122 = vmatmul.bf16.gmra.mxu2 %v974_v26  ;;  %v1298_v30 = vpack.c.bf16 %v1236_v25, %v1235_v24  ;;  %v728_v32 = vadd.f32 %v727_v29, %v438_v28  ;;  %v3332_v29 = vld [vmem:[%s4327_s1 + $0x160] sm:$0xff] }
 0x143   :  { %2392 = vmatmul.msk.bf16.gmra.mxu0 %vm277_vm0, %v232_v23 }
 0x144   :  { %2440 = vmatmul.msk.bf16.gmra.mxu1 %vm277_vm0, %v192_v27  ;;  %2502 = vmatmul.msk.bf16.gmra.mxu3 %vm277_vm0, %v1298_v30  ;;  %v858_v35 = vadd.f32 %v3069_v10, %v728_v32  ;;  %v3337_v30 = vld [vmem:[%s4327_s1 + $0x168] sm:$0xff]  ;;  %v3342_v32 = vld [vmem:[%s4326_s0 + $0x160] sm:$0xff] }
 0x145   :  { %v1083_v31 = vpop.f32.mrf.mxu2 }
 0x146   :  { %v1084_v37 = vadd.f32 %v3242_v43, %v1083_v31  ;;  %v922_v45 = vmax.f32 %v858_v35, 0.0 }
 0x148   :  { %v440_v33 = vpop.f32.mrf.mxu0  ;;  %v1237_v49 = vmax.f32 %v1084_v37, 0.0  ;;  %v235_v37 = vpack.c.bf16 %v3337_v30, %v3332_v29 }
 0x149   :  { %v729_v34 = vpop.f32.mrf.mxu1 }
 0x14a   :  { %v730_v36 = vadd.f32 %v729_v34, %v440_v33  ;;  %v3347_v33 = vld [vmem:[%s4326_s0 + $0x168] sm:$0xff] }
 0x14c   :  { %v859_v38 = vadd.f32 %v3069_v10, %v730_v36 }
 0x14d   :  { %v1085_v41 = vpop.f32.mrf.mxu2 }
 0x14e   :  { %v1086_v46 = vadd.f32 %v3242_v43, %v1085_v41  ;;  %v923_v47 = vmax.f32 %v859_v38, 0.0  ;;  %v195_v41 = vpack.c.bf16 %v3347_v33, %v3342_v32 }
 0x150   :  { %v1238_v50 = vmax.f32 %v1086_v46, 0.0  ;;  %v975_v51 = vpack.c.bf16 %v923_v47, %v922_v45  ;;  %v443_v53 = vpop.f32.mrf.mxu0 }
 0x151   :  { %v732_v54 = vpop.f32.mrf.mxu1 }
 0x152   :  { %1127 = vmatmul.bf16.gmra.mxu2 %v975_v51  ;;  %v1299_v59 = vpack.c.bf16 %v1238_v50, %v1237_v49  ;;  %v733_v61 = vadd.f32 %v732_v54, %v443_v53  ;;  %v3363_v54 = vld [vmem:[%s4327_s1 + $0x170] sm:$0xff] }
 0x153   :  { %2393 = vmatmul.msk.bf16.gmra.mxu0 %vm277_vm0, %v233_v48 }
 0x154   :  { %2441 = vmatmul.msk.bf16.gmra.mxu1 %vm277_vm0, %v193_v52  ;;  %2503 = vmatmul.msk.bf16.gmra.mxu3 %vm277_vm0, %v1299_v59  ;;  %v860_v0 = vadd.f32 %v3069_v10, %v733_v61  ;;  %v3368_v59 = vld [vmem:[%s4327_s1 + $0x178] sm:$0xff]  ;;  %v3373_v61 = vld [vmem:[%s4326_s0 + $0x170] sm:$0xff] }
 0x155   :  { %v1088_v60 = vpop.f32.mrf.mxu2 }
 0x156   :  { %v1089_v2 = vadd.f32 %v3242_v43, %v1088_v60  ;;  %v924_v9 = vmax.f32 %v860_v0, 0.0 }
 0x158   :  { %v445_v62 = vpop.f32.mrf.mxu0  ;;  %v1239_v14 = vmax.f32 %v1089_v2, 0.0  ;;  %v236_v2 = vpack.c.bf16 %v3368_v59, %v3363_v54 }
 0x159   :  { %v734_v63 = vpop.f32.mrf.mxu1 }
 0x15a   :  { %v735_v1 = vadd.f32 %v734_v63, %v445_v62  ;;  %v3378_v62 = vld [vmem:[%s4326_s0 + $0x178] sm:$0xff] }
 0x15b   :  { %v196_v7 = vpack.c.bf16 %v3378_v62, %v3373_v61 }
 0x15c   :  { %v861_v3 = vadd.f32 %v3069_v10, %v735_v1 }
 0x15d   :  { %v1090_v6 = vpop.f32.mrf.mxu2 }
 0x15e   :  { %v925_v11 = vmax.f32 %v861_v3, 0.0  ;;  %v1091_v12 = vadd.f32 %v3242_v43, %v1090_v6 }
 0x160   :  { %v1240_v15 = vmax.f32 %v1091_v12, 0.0  ;;  %v976_v16 = vpack.c.bf16 %v925_v11, %v924_v9  ;;  %v448_v18 = vpop.f32.mrf.mxu0 }
 0x161   :  { %v737_v19 = vpop.f32.mrf.mxu1 }
 0x162   :  { %1132 = vmatmul.bf16.gmra.mxu2 %v976_v16  ;;  %v1300_v20 = vpack.c.bf16 %v1240_v15, %v1239_v14  ;;  %v738_v22 = vadd.f32 %v737_v19, %v448_v18 }
 0x163   :  { %2394 = vmatmul.msk.bf16.gmra.mxu0 %vm277_vm0, %v234_v13 }
 0x164   :  { %2442 = vmatmul.msk.bf16.gmra.mxu1 %vm277_vm0, %v194_v17  ;;  %2504 = vmatmul.msk.bf16.gmra.mxu3 %vm277_vm0, %v1300_v20  ;;  %v862_v25 = vadd.f32 %v3069_v10, %v738_v22  ;;  %v158_v22 = vld [vmem:[%s4327_s1 + $0x188] sm:$0xff] }
 0x165   :  { %v1093_v21 = vpop.f32.mrf.mxu2 }
 0x166   :  { %v1094_v27 = vadd.f32 %v3242_v43, %v1093_v21  ;;  %v926_v34 = vmax.f32 %v862_v25, 0.0  ;;  %v157_v21 = vld [vmem:[%s4327_s1 + $0x180] sm:$0xff]  ;;  %v94_v25 = vld [vmem:[%s4326_s0 + $0x188] sm:$0xff] }
 0x168   :  { %v450_v23 = vpop.f32.mrf.mxu0  ;;  %v1241_v38 = vmax.f32 %v1094_v27, 0.0 }
 0x169   :  { %v739_v24 = vpop.f32.mrf.mxu1 }
 0x16a   :  { %v740_v26 = vadd.f32 %v739_v24, %v450_v23  ;;  %v93_v24 = vld [vmem:[%s4326_s0 + $0x180] sm:$0xff] }
 0x16c   :  { %v863_v28 = vadd.f32 %v3069_v10, %v740_v26 }
 0x16d   :  { %v1095_v31 = vpop.f32.mrf.mxu2 }
 0x16e   :  { %v927_v35 = vmax.f32 %v863_v28, 0.0  ;;  %v1096_v36 = vadd.f32 %v3242_v43, %v1095_v31  ;;  %v237_v31 = vpack.c.bf16 %v158_v22, %v157_v21  ;;  %v161_v21 = vld [vmem:[%s4327_s1 + $0x1a0] sm:$0xff]  ;;  %v162_v22 = vld [vmem:[%s4327_s1 + $0x1a8] sm:$0xff] }
 0x170   :  { %v1242_v39 = vmax.f32 %v1096_v36, 0.0  ;;  %v977_v40 = vpack.c.bf16 %v927_v35, %v926_v34  ;;  %v453_v42 = vpop.f32.mrf.mxu0 }
 0x171   :  { %v742_v44 = vpop.f32.mrf.mxu1 }
 0x172   :  { %1137 = vmatmul.bf16.gmra.mxu2 %v977_v40  ;;  %v1301_v45 = vpack.c.bf16 %v1242_v39, %v1241_v38  ;;  %v743_v47 = vadd.f32 %v742_v44, %v453_v42 }
 0x173   :  { %2395 = vmatmul.msk.bf16.gmra.mxu0 %vm277_vm0, %v235_v37  ;;  %v197_v37 = vpack.c.bf16 %v94_v25, %v93_v24  ;;  %v97_v24 = vld [vmem:[%s4326_s0 + $0x1a0] sm:$0xff]  ;;  %v98_v25 = vld [vmem:[%s4326_s0 + $0x1a8] sm:$0xff] }
 0x174   :  { %2443 = vmatmul.msk.bf16.gmra.mxu1 %vm277_vm0, %v195_v41  ;;  %2505 = vmatmul.msk.bf16.gmra.mxu3 %vm277_vm0, %v1301_v45  ;;  %v864_v50 = vadd.f32 %v3069_v10, %v743_v47 }
 0x175   :  { %v1098_v46 = vpop.f32.mrf.mxu2 }
 0x176   :  { %v1099_v52 = vadd.f32 %v3242_v43, %v1098_v46  ;;  %v928_v63 = vmax.f32 %v864_v50, 0.0  ;;  %v159_v50 = vld [vmem:[%s4327_s1 + $0x190] sm:$0xff] }
 0x178   :  { %v455_v48 = vpop.f32.mrf.mxu0  ;;  %v1243_v3 = vmax.f32 %v1099_v52, 0.0 }
 0x179   :  { %v744_v49 = vpop.f32.mrf.mxu1 }
 0x17a   :  { %v745_v51 = vadd.f32 %v744_v49, %v455_v48 }
 0x17c   :  { %v865_v53 = vadd.f32 %v3069_v10, %v745_v51  ;;  %v160_v51 = vld [vmem:[%s4327_s1 + $0x198] sm:$0xff] }
 0x17d   :  { %v1100_v60 = vpop.f32.mrf.mxu2 }
 0x17e   :  { %v929_v0 = vmax.f32 %v865_v53, 0.0  ;;  %v1101_v1 = vadd.f32 %v3242_v43, %v1100_v60  ;;  %v95_v53 = vld [vmem:[%s4326_s0 + $0x190] sm:$0xff]  ;;  %v96_v60 = vld [vmem:[%s4326_s0 + $0x198] sm:$0xff] }
 0x180   :  { %v1244_v4 = vmax.f32 %v1101_v1, 0.0  ;;  %v978_v6 = vpack.c.bf16 %v929_v0, %v928_v63  ;;  %v458_v9 = vpop.f32.mrf.mxu0 }
 0x181   :  { %v747_v11 = vpop.f32.mrf.mxu1 }
 0x182   :  { %1142 = vmatmul.bf16.gmra.mxu2 %v978_v6  ;;  %v1302_v12 = vpack.c.bf16 %v1244_v4, %v1243_v3  ;;  %v748_v14 = vadd.f32 %v747_v11, %v458_v9 }
 0x183   :  { %2396 = vmatmul.msk.bf16.gmra.mxu0 %vm277_vm0, %v236_v2  ;;  %v238_v2 = vpack.c.bf16 %v160_v51, %v159_v50  ;;  %v163_v51 = vld [vmem:[%s4327_s1 + $0x1b0] sm:$0xff] }
 0x184   :  { %2444 = vmatmul.msk.bf16.gmra.mxu1 %vm277_vm0, %v196_v7  ;;  %2506 = vmatmul.msk.bf16.gmra.mxu3 %vm277_vm0, %v1302_v12  ;;  %v866_v17 = vadd.f32 %v3069_v10, %v748_v14  ;;  %v198_v7 = vpack.c.bf16 %v96_v60, %v95_v53  ;;  %v99_v60 = vld [vmem:[%s4326_s0 + $0x1b0] sm:$0xff] }
 0x185   :  { %v1103_v13 = vpop.f32.mrf.mxu2 }
 0x186   :  { %v1104_v19 = vadd.f32 %v3242_v43, %v1103_v13  ;;  %v930_v26 = vmax.f32 %v866_v17, 0.0 }
 0x188   :  { %v460_v15 = vpop.f32.mrf.mxu0  ;;  %v1245_v34 = vmax.f32 %v1104_v19, 0.0 }
 0x189   :  { %v749_v16 = vpop.f32.mrf.mxu1 }
 0x18a   :  { %v750_v18 = vadd.f32 %v749_v16, %v460_v15 }
 0x18c   :  { %v867_v20 = vadd.f32 %v3069_v10, %v750_v18 }
 0x18d   :  { %v1105_v23 = vpop.f32.mrf.mxu2 }
 0x18e   :  { %v931_v27 = vmax.f32 %v867_v20, 0.0  ;;  %v1106_v28 = vadd.f32 %v3242_v43, %v1105_v23 }
 0x190   :  { %v1246_v35 = vmax.f32 %v1106_v28, 0.0  ;;  %v979_v36 = vpack.c.bf16 %v931_v27, %v930_v26  ;;  %v463_v38 = vpop.f32.mrf.mxu0 }
 0x191   :  { %v752_v39 = vpop.f32.mrf.mxu1 }
 0x192   :  { %1147 = vmatmul.bf16.gmra.mxu2 %v979_v36  ;;  %v1303_v40 = vpack.c.bf16 %v1246_v35, %v1245_v34  ;;  %v753_v42 = vadd.f32 %v752_v39, %v463_v38 }
 0x193   :  { %2397 = vmatmul.msk.bf16.gmra.mxu0 %vm277_vm0, %v237_v31  ;;  %v239_v31 = vpack.c.bf16 %v162_v22, %v161_v21  ;;  %v3474_v22 = vld [vmem:[%s4327_s1 + $0x1c0] sm:$0xff] }
 0x194   :  { %2445 = vmatmul.msk.bf16.gmra.mxu1 %vm277_vm0, %v197_v37  ;;  %2507 = vmatmul.msk.bf16.gmra.mxu3 %vm277_vm0, %v1303_v40  ;;  %v868_v46 = vadd.f32 %v3069_v10, %v753_v42  ;;  %v199_v37 = vpack.c.bf16 %v98_v25, %v97_v24  ;;  %v3481_v25 = vld [vmem:[%s4327_s1 + $0x1c8] sm:$0xff] }
 0x195   :  { %v1108_v41 = vpop.f32.mrf.mxu2 }
 0x196   :  { %v1109_v48 = vadd.f32 %v3242_v43, %v1108_v41  ;;  %v932_v63 = vmax.f32 %v868_v46, 0.0 }
 0x198   :  { %v465_v44 = vpop.f32.mrf.mxu0  ;;  %v1247_v3 = vmax.f32 %v1109_v48, 0.0 }
 0x199   :  { %v754_v45 = vpop.f32.mrf.mxu1 }
 0x19a   :  { %v755_v47 = vadd.f32 %v754_v45, %v465_v44 }
 0x19c   :  { %v869_v49 = vadd.f32 %v3069_v10, %v755_v47 }
 0x19d   :  { %v1110_v52 = vpop.f32.mrf.mxu2 }
 0x19e   :  { %v933_v0 = vmax.f32 %v869_v49, 0.0  ;;  %v1111_v1 = vadd.f32 %v3242_v43, %v1110_v52  ;;  %v164_v52 = vld [vmem:[%s4327_s1 + $0x1b8] sm:$0xff] }
 0x1a0   :  { %v1248_v4 = vmax.f32 %v1111_v1, 0.0  ;;  %v980_v6 = vpack.c.bf16 %v933_v0, %v932_v63  ;;  %v468_v9 = vpop.f32.mrf.mxu0  ;;  %v100_v63 = vld [vmem:[%s4326_s0 + $0x1b8] sm:$0xff] }
 0x1a1   :  { %v757_v11 = vpop.f32.mrf.mxu1 }
 0x1a2   :  { %1152 = vmatmul.bf16.gmra.mxu2 %v980_v6  ;;  %v1304_v12 = vpack.c.bf16 %v1248_v4, %v1247_v3  ;;  %v758_v14 = vadd.f32 %v757_v11, %v468_v9  ;;  %v240_v3 = vpack.c.bf16 %v164_v52, %v163_v51  ;;  %v200_v11 = vpack.c.bf16 %v100_v63, %v99_v60  ;;  %v2695_v51 = vld [vmem:[%s4327_s1 + $0x78] sm:$0xff] }
 0x1a3   :  { %2398 = vmatmul.msk.bf16.gmra.mxu0 %vm277_vm0, %v238_v2  ;;  %v2696_v52 = vld [vmem:[%s4326_s0 + $0x78] sm:$0xff] }
 0x1a4   :  { %2446 = vmatmul.msk.bf16.gmra.mxu1 %vm277_vm0, %v198_v7  ;;  %2508 = vmatmul.msk.bf16.gmra.mxu3 %vm277_vm0, %v1304_v12  ;;  %v870_v17 = vadd.f32 %v3069_v10, %v758_v14 }
 0x1a5   :  { %v1113_v13 = vpop.f32.mrf.mxu2 }
 0x1a6   :  { %v1114_v19 = vadd.f32 %v3242_v43, %v1113_v13  ;;  %v934_v26 = vmax.f32 %v870_v17, 0.0 }
 0x1a8   :  { %v470_v15 = vpop.f32.mrf.mxu0  ;;  %v1249_v34 = vmax.f32 %v1114_v19, 0.0 }
 0x1a9   :  { %v759_v16 = vpop.f32.mrf.mxu1 }
 0x1aa   :  { %v760_v18 = vadd.f32 %v759_v16, %v470_v15 }
 0x1ac   :  { %v871_v20 = vadd.f32 %v3069_v10, %v760_v18 }
 0x1ad   :  { %v1115_v23 = vpop.f32.mrf.mxu2 }
 0x1ae   :  { %v935_v27 = vmax.f32 %v871_v20, 0.0  ;;  %v1116_v28 = vadd.f32 %v3242_v43, %v1115_v23 }
 0x1b0   :  { %v1250_v35 = vmax.f32 %v1116_v28, 0.0  ;;  %v981_v36 = vpack.c.bf16 %v935_v27, %v934_v26  ;;  %v473_v38 = vpop.f32.mrf.mxu0  ;;  %v3486_v26 = vld [vmem:[%s4326_s0 + $0x1c0] sm:$0xff]  ;;  %v3491_v27 = vld [vmem:[%s4326_s0 + $0x1c8] sm:$0xff] }
 0x1b1   :  { %v762_v39 = vpop.f32.mrf.mxu1 }
 0x1b2   :  { %1157 = vmatmul.bf16.gmra.mxu2 %v981_v36  ;;  %v1305_v40 = vpack.c.bf16 %v1250_v35, %v1249_v34  ;;  %v763_v42 = vadd.f32 %v762_v39, %v473_v38  ;;  %v1741_v35 = vmul.f32 %v3368_v59, %v3378_v62  ;;  %v241_v36 = vpack.c.bf16 %v3481_v25, %v3474_v22  ;;  %v3503_v38 = vld [vmem:[%s4326_s0 + $0x1f8] sm:$0xff] }
 0x1b3   :  { %2399 = vmatmul.msk.bf16.gmra.mxu0 %vm277_vm0, %v239_v31  ;;  %v3508_v39 = vld [vmem:[%s4327_s1 + $0x1f8] sm:$0xff] }
 0x1b4   :  { %2447 = vmatmul.msk.bf16.gmra.mxu1 %vm277_vm0, %v199_v37  ;;  %2509 = vmatmul.msk.bf16.gmra.mxu3 %vm277_vm0, %v1305_v40  ;;  %v872_v47 = vadd.f32 %v3069_v10, %v763_v42  ;;  %v201_v37 = vpack.c.bf16 %v3491_v27, %v3486_v26  ;;  %v1757_v62 = vmul.f32 %v3508_v39, %v3503_v38 }
 0x1b5   :  { %v1118_v41 = vpop.f32.mrf.mxu2  ;;  %2567 = vmatpush.xpose.msk.msrb.mxu3 %vm277_vm0, %v1741_v35 }
 0x1b6   :  { %v1119_v49 = vadd.f32 %v3242_v43, %v1118_v41  ;;  %v936_v0 = vmax.f32 %v872_v47, 0.0  ;;  %2584 = vmatpush.xpose.msk.msrb.mxu2 %vm277_vm0, %v1757_v62 }
 0x1b7   :  { %v3445_v44 = vpop.f32.mrf.mxu3 }
 0x1b8   :  { %v475_v45 = vpop.f32.mrf.mxu0  ;;  %v1251_v4 = vmax.f32 %v1119_v49, 0.0 }
 0x1b9   :  { %v764_v46 = vpop.f32.mrf.mxu1 }
 0x1ba   :  { %v765_v48 = vadd.f32 %v764_v46, %v475_v45 }
 0x1bc   :  { %v873_v50 = vadd.f32 %v3069_v10, %v765_v48 }
 0x1bd   :  { %v1120_v53 = vpop.f32.mrf.mxu2 }
 0x1be   :  { %v937_v1 = vmax.f32 %v873_v50, 0.0  ;;  %v1121_v2 = vadd.f32 %v3242_v43, %v1120_v53  ;;  %v1725_v50 = vmul.f32 %v3177_v56, %v3187_v58  ;;  %v1709_v53 = vmul.f32 %v2696_v52, %v2695_v51  ;;  %v3534_v56 = vld [vmem:[%s4330_s4] ss:$0 sm:$0xff] }
 0x1bf   :  { %v3463_v7 = vpop.f32.mrf.mxu3 }
 0x1c0   :  { %v1252_v6 = vmax.f32 %v1121_v2, 0.0  ;;  %v982_v9 = vpack.c.bf16 %v937_v1, %v936_v0  ;;  %v478_v12 = vpop.f32.mrf.mxu0  ;;  %2550 = vmatpush.xpose.msk.msrb.mxu1 %vm277_vm0, %v1725_v50  ;;  %2533 = vmatpush.xpose.msk.msrb.mxu0 %vm277_vm0, %v1709_v53  ;;  %v2698_v2 = vld [vmem:[%s4327_s1 + $0x70] sm:$0xff] }
 0x1c1   :  { %v767_v13 = vpop.f32.mrf.mxu1 }
 0x1c2   :  { %1162 = vmatmul.bf16.gmra.mxu2 %v982_v9  ;;  %v1306_v14 = vpack.c.bf16 %v1252_v6, %v1251_v4  ;;  %v768_v16 = vadd.f32 %v767_v13, %v478_v12  ;;  %v3553_v12 = vld [vmem:[%s4327_s1 + $0x1d8] sm:$0xff] }
 0x1c3   :  { %2400 = vmatmul.msk.bf16.gmra.mxu0 %vm277_vm0, %v240_v3  ;;  %v2699_v3 = vld [vmem:[%s4326_s0 + $0x70] sm:$0xff] }
 0x1c4   :  { %2448 = vmatmul.msk.bf16.gmra.mxu1 %vm277_vm0, %v200_v11  ;;  %2510 = vmatmul.msk.bf16.gmra.mxu3 %vm277_vm0, %v1306_v14  ;;  %v874_v20 = vadd.f32 %v3069_v10, %v768_v16  ;;  %v1708_v4 = vmul.f32 %v2699_v3, %v2698_v2  ;;  %v3548_v11 = vld [vmem:[%s4327_s1 + $0x1d0] sm:$0xff] }
 0x1c5   :  { %v1123_v15 = vpop.f32.mrf.mxu2  ;;  %v3559_v14 = vld [vmem:[%s4326_s0 + $0x1d0] sm:$0xff] }
 0x1c6   :  { %v1124_v23 = vadd.f32 %v3242_v43, %v1123_v15  ;;  %v938_v31 = vmax.f32 %v874_v20, 0.0  ;;  %2534 = vmatpush.xpose.msk.msrb.mxu0 %vm277_vm0, %v1708_v4  ;;  %v3564_v15 = vld [vmem:[%s4326_s0 + $0x1d8] sm:$0xff]  ;;  %v2700_v20 = vld [vmem:[%s4327_s1 + $0x68] sm:$0xff]  ;;  %v3611_v4 = vld [vmem:[%s4326_s0 + $0x1f0] sm:$0xff] }
 0x1c7   :  { %v3468_v17 = vpop.f32.mrf.mxu3  ;;  %v202_v35 = vpack.c.bf16 %v3564_v15, %v3559_v14 }
 0x1c8   :  { %v480_v18 = vpop.f32.mrf.mxu0  ;;  %v1253_v40 = vmax.f32 %v1124_v23, 0.0 }
 0x1c9   :  { %v769_v19 = vpop.f32.mrf.mxu1 }
 0x1ca   :  { %v770_v21 = vadd.f32 %v769_v19, %v480_v18 }
 0x1cc   :  { %v875_v24 = vadd.f32 %v3069_v10, %v770_v21  ;;  %v2701_v21 = vld [vmem:[%s4326_s0 + $0x68] sm:$0xff] }
 0x1cd   :  { %v1125_v28 = vpop.f32.mrf.mxu2  ;;  %v1707_v23 = vmul.f32 %v2701_v21, %v2700_v20  ;;  %v3636_v20 = vld [vmem:[%s4326_s0 + $0x1e8] sm:$0xff] }
 0x1ce   :  { %v939_v34 = vmax.f32 %v875_v24, 0.0  ;;  %v1126_v10 = vadd.f32 %v3242_v43, %v1125_v28  ;;  %v242_v24 = vpack.c.bf16 %v3553_v12, %v3548_v11 }
 0x1cf   :  { %v3510_v42 = vpop.f32.mrf.mxu3  ;;  %2535 = vmatpush.xpose.msk.msrb.mxu0 %vm277_vm0, %v1707_v23 }
 0x1d0   :  { %v1254_v41 = vmax.f32 %v1126_v10, 0.0  ;;  %v983_v59 = vpack.c.bf16 %v939_v34, %v938_v31  ;;  %v483_v45 = vpop.f32.mrf.mxu0 }
 0x1d1   :  { %v772_v46 = vpop.f32.mrf.mxu1 }
 0x1d2   :  { %1167 = vmatmul.bf16.gmra.mxu2 %v983_v59  ;;  %v1307_v47 = vpack.c.bf16 %v1254_v41, %v1253_v40  ;;  %v773_v49 = vadd.f32 %v772_v46, %v483_v45  ;;  %v2702_v41 = vld [vmem:[%s4327_s1 + $0x60] sm:$0xff] }
 0x1d3   :  { %2401 = vmatmul.msk.bf16.gmra.mxu0 %vm277_vm0, %v241_v36  ;;  %v2703_v59 = vld [vmem:[%s4326_s0 + $0x60] sm:$0xff] }
 0x1d4   :  { %2449 = vmatmul.msk.bf16.gmra.mxu1 %vm277_vm0, %v201_v37  ;;  %2511 = vmatmul.msk.bf16.gmra.mxu3 %vm277_vm0, %v1307_v47  ;;  %v876_v58 = vadd.f32 %v3534_v56, %v773_v49  ;;  %v1706_v62 = vmul.f32 %v2703_v59, %v2702_v41  ;;  %v2704_v47 = vld [vmem:[%s4327_s1 + $0x58] sm:$0xff] }
 0x1d5   :  { %v1128_v48 = vpop.f32.mrf.mxu2 }
 0x1d6   :  { %v1129_v6 = vadd.f32 %v3242_v43, %v1128_v48  ;;  %v940_v16 = vmax.f32 %v876_v58, 0.0  ;;  %2536 = vmatpush.xpose.msk.msrb.mxu0 %vm277_vm0, %v1706_v62  ;;  %v2705_v48 = vld [vmem:[%s4326_s0 + $0x58] sm:$0xff]  ;;  %v2707_v58 = vld [vmem:[%s4326_s0 + $0x50] sm:$0xff] }
 0x1d7   :  { %v3527_v60 = vpop.f32.mrf.mxu3  ;;  %v1705_v49 = vmul.f32 %v2705_v48, %v2704_v47  ;;  %v2711_v47 = vld [vmem:[%s4326_s0 + $0x40] sm:$0xff] }
 0x1d8   :  { %v485_v63 = vpop.f32.mrf.mxu0  ;;  %v1255_v28 = vmax.f32 %v1129_v6, 0.0  ;;  %v3616_v6 = vld [vmem:[%s4327_s1 + $0x1e0] sm:$0xff] }
 0x1d9   :  { %v774_v0 = vpop.f32.mrf.mxu1 }
 0x1da   :  { %v775_v1 = vadd.f32 %v774_v0, %v485_v63  ;;  %2537 = vmatpush.xpose.msk.msrb.mxu0 %vm277_vm0, %v1705_v49  ;;  %v2706_v0 = vld [vmem:[%s4327_s1 + $0x50] sm:$0xff] }
 0x1dc   :  { %v877_v9 = vadd.f32 %v3534_v56, %v775_v1  ;;  %v1704_v1 = vmul.f32 %v2707_v58, %v2706_v0 }
 0x1dd   :  { %v1130_v13 = vpop.f32.mrf.mxu2 }
 0x1de   :  { %v941_v18 = vmax.f32 %v877_v9, 0.0  ;;  %v1131_v19 = vadd.f32 %v3242_v43, %v1130_v13  ;;  %v3621_v9 = vld [vmem:[%s4327_s1 + $0x1e8] sm:$0xff]  ;;  %2538 = vmatpush.xpose.msk.msrb.mxu0 %vm277_vm0, %v1704_v1 }
 0x1df   :  { %v3575_v34 = vpop.f32.mrf.mxu3 }
 0x1e0   :  { %v1256_v31 = vmax.f32 %v1131_v19, 0.0  ;;  %v984_v10 = vpack.c.bf16 %v941_v18, %v940_v16  ;;  %v488_v36 = vpop.f32.mrf.mxu0  ;;  %v3626_v16 = vld [vmem:[%s4327_s1 + $0x1f0] sm:$0xff]  ;;  %v3631_v19 = vld [vmem:[%s4326_s0 + $0x1e0] sm:$0xff] }
 0x1e1   :  { %v777_v37 = vpop.f32.mrf.mxu1 }
 0x1e2   :  { %1172 = vmatmul.bf16.gmra.mxu2 %v984_v10  ;;  %v1308_v40 = vpack.c.bf16 %v1256_v31, %v1255_v28  ;;  %v778_v45 = vadd.f32 %v777_v37, %v488_v36  ;;  %v1756_v28 = vmul.f32 %v3626_v16, %v3611_v4  ;;  %v243_v31 = vpack.c.bf16 %v3621_v9, %v3616_v6  ;;  %v2708_v10 = vld [vmem:[%s4327_s1 + $0x48] sm:$0xff] }
 0x1e3   :  { %2402 = vmatmul.msk.bf16.gmra.mxu0 %vm277_vm0, %v242_v24  ;;  %v1740_v24 = vmul.f32 %v3363_v54, %v3373_v61  ;;  %v203_v61 = vpack.c.bf16 %v3636_v20, %v3631_v19 }
 0x1e4   :  { %2450 = vmatmul.msk.bf16.gmra.mxu1 %vm277_vm0, %v202_v35  ;;  %2512 = vmatmul.msk.bf16.gmra.mxu3 %vm277_vm0, %v1308_v40  ;;  %v878_v51 = vadd.f32 %v3534_v56, %v778_v45  ;;  %v2709_v35 = vld [vmem:[%s4326_s0 + $0x48] sm:$0xff] }
 0x1e5   :  { %v1133_v46 = vpop.f32.mrf.mxu2  ;;  %v1703_v36 = vmul.f32 %v2709_v35, %v2708_v10  ;;  %2568 = vmatpush.xpose.msk.msrb.mxu3 %vm277_vm0, %v1740_v24  ;;  %2585 = vmatpush.xpose.msk.msrb.mxu2 %vm277_vm0, %v1756_v28  ;;  %v2716_v35 = vld [vmem:[%s4327_s1 + $0x28] sm:$0xff] }
 0x1e6   :  { %v1134_v2 = vadd.f32 %v3242_v43, %v1133_v46  ;;  %v942_v13 = vmax.f32 %v878_v51, 0.0  ;;  %v2710_v46 = vld [vmem:[%s4327_s1 + $0x40] sm:$0xff] }
 0x1e7   :  { %v3596_v50 = vpop.f32.mrf.mxu3  ;;  %2539 = vmatpush.xpose.msk.msrb.mxu0 %vm277_vm0, %v1703_v36  ;;  %v1702_v48 = vmul.f32 %v2711_v47, %v2710_v46  ;;  %v2717_v36 = vld [vmem:[%s4326_s0 + $0x28] sm:$0xff] }
 0x1e8   :  { %v490_v52 = vpop.f32.mrf.mxu0  ;;  %v1257_v37 = vmax.f32 %v1134_v2, 0.0 }
 0x1e9   :  { %v779_v53 = vpop.f32.mrf.mxu1 }
 0x1ea   :  { %v780_v63 = vadd.f32 %v779_v53, %v490_v52  ;;  %v1724_v52 = vmul.f32 %v3172_v55, %v3182_v57  ;;  %v2712_v53 = vld [vmem:[%s4327_s1 + $0x38] sm:$0xff]  ;;  %v2714_v57 = vld [vmem:[%s4327_s1 + $0x30] sm:$0xff] }
 0x1eb   :  { %2540 = vmatpush.xpose.msk.msrb.mxu0 %vm277_vm0, %v1702_v48 }
 0x1ec   :  { %v879_v3 = vadd.f32 %v3534_v56, %v780_v63  ;;  %v2713_v63 = vld [vmem:[%s4326_s0 + $0x38] sm:$0xff]  ;;  %2551 = vmatpush.xpose.msk.msrb.mxu1 %vm277_vm0, %v1724_v52 }
 0x1ed   :  { %v1135_v18 = vpop.f32.mrf.mxu2  ;;  %v1701_v0 = vmul.f32 %v2713_v63, %v2712_v53  ;;  %v2721_v52 = vld [vmem:[%s4326_s0 + $0x18] sm:$0xff] }
 0x1ee   :  { %v943_v21 = vmax.f32 %v879_v3, 0.0  ;;  %v1136_v23 = vadd.f32 %v3242_v43, %v1135_v18 }
 0x1ef   :  { %v3652_v41 = vpop.f32.mrf.mxu3  ;;  %2541 = vmatpush.xpose.msk.msrb.mxu0 %vm277_vm0, %v1701_v0 }
 0x1f0   :  { %v1258_v40 = vmax.f32 %v1136_v23, 0.0  ;;  %v985_v54 = vpack.c.bf16 %v943_v21, %v942_v13  ;;  %v493_v59 = vpop.f32.mrf.mxu0  ;;  %v2715_v13 = vld [vmem:[%s4326_s0 + $0x30] sm:$0xff] }
 0x1f1   :  { %v782_v62 = vpop.f32.mrf.mxu1  ;;  %v1700_v18 = vmul.f32 %v2715_v13, %v2714_v57  ;;  %v2723_v57 = vld [vmem:[%s4326_s0 + $0x10] sm:$0xff] }
 0x1f2   :  { %v1309_v45 = vpack.c.bf16 %v1258_v40, %v1257_v37  ;;  %1177 = vmatmul.bf16.gmra.mxu2 %v985_v54  ;;  %v783_v51 = vadd.f32 %v782_v62, %v493_v59  ;;  %v1699_v37 = vmul.f32 %v2717_v36, %v2716_v35  ;;  %v204_v40 = vpack.c.bf16 %v3503_v38, %v3611_v4  ;;  %v2719_v38 = vld [vmem:[%s4326_s0 + $0x20] sm:$0xff]  ;;  %v2724_v36 = vld [vmem:[%s4327_s1 + $0x8] sm:$0xff] }
 0x1f3   :  { %2403 = vmatmul.msk.bf16.gmra.mxu0 %vm277_vm0, %v243_v31  ;;  %v244_v54 = vpack.c.bf16 %v3508_v39, %v3626_v16  ;;  %v1755_v35 = vmul.f32 %v3621_v9, %v3636_v20  ;;  %v2726_v20 = vld [vmem:[%s4327_s1] sm:$0xff] }
 0x1f4   :  { %2451 = vmatmul.msk.bf16.gmra.mxu1 %vm277_vm0, %v203_v61  ;;  %2513 = vmatmul.msk.bf16.gmra.mxu3 %vm277_vm0, %v1309_v45  ;;  %v880_v3 = vadd.f32 %v3534_v56, %v783_v51  ;;  %v2720_v51 = vld [vmem:[%s4327_s1 + $0x18] sm:$0xff] }
 0x1f5   :  { %v1138_v49 = vpop.f32.mrf.mxu2  ;;  %2542 = vmatpush.xpose.msk.msrb.mxu0 %vm277_vm0, %v1700_v18  ;;  %v1697_v53 = vmul.f32 %v2721_v52, %v2720_v51  ;;  %2586 = vmatpush.xpose.msk.msrb.mxu2 %vm277_vm0, %v1755_v35 }
 0x1f6   :  { %v1139_v21 = vadd.f32 %v3242_v43, %v1138_v49  ;;  %v944_v28 = vmax.f32 %v880_v3, 0.0  ;;  %v2718_v49 = vld [vmem:[%s4327_s1 + $0x20] sm:$0xff] }
 0x1f7   :  { %v3677_v58 = vpop.f32.mrf.mxu3  ;;  %v1698_v39 = vmul.f32 %v2719_v38, %v2718_v49  ;;  %v2728_v38 = vld [vmem:[%s4327_s1 + $0xe8] sm:$0xff] }
 0x1f8   :  { %v495_v1 = vpop.f32.mrf.mxu0  ;;  %v1259_v61 = vmax.f32 %v1139_v21, 0.0 }
 0x1f9   :  { %v784_v2 = vpop.f32.mrf.mxu1  ;;  %2543 = vmatpush.xpose.msk.msrb.mxu0 %vm277_vm0, %v1699_v37  ;;  %v2725_v37 = vld [vmem:[%s4326_s0 + $0x8] sm:$0xff] }
 0x1fa   :  { %v785_v55 = vadd.f32 %v784_v2, %v495_v1 }
 0x1fc   :  { %v881_v23 = vadd.f32 %v3534_v56, %v785_v55  ;;  %v2722_v55 = vld [vmem:[%s4327_s1 + $0x10] sm:$0xff] }
 0x1fd   :  { %v1140_v24 = vpop.f32.mrf.mxu2  ;;  %2544 = vmatpush.xpose.msk.msrb.mxu0 %vm277_vm0, %v1698_v39  ;;  %v1696_v13 = vmul.f32 %v2723_v57, %v2722_v55  ;;  %v2729_v39 = vld [vmem:[%s4326_s0 + $0xe8] sm:$0xff] }
 0x1fe   :  { %v945_v31 = vmax.f32 %v881_v23, 0.0  ;;  %v1141_v10 = vadd.f32 %v3242_v43, %v1140_v24 }
 0x1ff   :  { %v3702_v62 = vpop.f32.mrf.mxu3 }
 0x200   :  { %v1260_v59 = vmax.f32 %v1141_v10, 0.0  ;;  %v986_v45 = vpack.c.bf16 %v945_v31, %v944_v28  ;;  %v498_v46 = vpop.f32.mrf.mxu0  ;;  %v1739_v10 = vmul.f32 %v3337_v30, %v3347_v33 }
 0x201   :  { %v787_v47 = vpop.f32.mrf.mxu1  ;;  %2545 = vmatpush.xpose.msk.msrb.mxu0 %vm277_vm0, %v1697_v53 }
 0x202   :  { %v1310_v48 = vpack.c.bf16 %v1260_v59, %v1259_v61  ;;  %1182 = vmatmul.bf16.gmra.mxu2 %v986_v45  ;;  %v788_v4 = vadd.f32 %v787_v47, %v498_v46  ;;  %2569 = vmatpush.xpose.msk.msrb.mxu3 %vm277_vm0, %v1739_v10  ;;  %v2727_v46 = vld [vmem:[%s4326_s0] sm:$0xff] }
 0x203   :  { %2404 = vmatmul.msk.bf16.gmra.mxu0 %vm277_vm0, %v244_v54  ;;  %v1694_v47 = vmul.f32 %v2727_v46, %v2726_v20 }
 0x204   :  { %2452 = vmatmul.msk.bf16.gmra.mxu1 %vm277_vm0, %v204_v40  ;;  %2514 = vmatmul.msk.bf16.gmra.mxu3 %vm277_vm0, %v1310_v48  ;;  %v882_v0 = vadd.f32 %v3534_v56, %v788_v4  ;;  %v1695_v40 = vmul.f32 %v2725_v37, %v2724_v36  ;;  %v1723_v4 = vmul.f32 %v2729_v39, %v2728_v38  ;;  %v3783_v38 = vld [vmem:[%s4334_s8] ss:$0 sm:$0xff] }
 0x205   :  { %v1143_v16 = vpop.f32.mrf.mxu2  ;;  %2546 = vmatpush.xpose.msk.msrb.mxu0 %vm277_vm0, %v1696_v13 }
 0x206   :  { %v1144_v18 = vadd.f32 %v3242_v43, %v1143_v16  ;;  %v946_v23 = vmax.f32 %v882_v0, 0.0  ;;  %2552 = vmatpush.xpose.msk.msrb.mxu1 %vm277_vm0, %v1723_v4 }
 0x207   :  { %v3721_v63 = vpop.f32.mrf.mxu3 }
 0x208   :  { %v500_v1 = vpop.f32.mrf.mxu0  ;;  %v1261_v54 = vmax.f32 %v1144_v18, 0.0 }
 0x209   :  { %v789_v2 = vpop.f32.mrf.mxu1  ;;  %2547 = vmatpush.xpose.msk.msrb.mxu0 %vm277_vm0, %v1695_v40 }
 0x20a   :  { %v790_v3 = vadd.f32 %v789_v2, %v500_v1 }
 0x20c   :  { %v883_v21 = vadd.f32 %v3534_v56, %v790_v3 }
 0x20d   :  { %v1145_v24 = vpop.f32.mrf.mxu2  ;;  %2548 = vmatpush.xpose.msk.msrb.mxu0 %vm277_vm0, %v1694_v47 }
 0x20e   :  { %v947_v28 = vmax.f32 %v883_v21, 0.0  ;;  %v1146_v31 = vadd.f32 %v3242_v43, %v1145_v24 }
 0x20f   :  { %v3745_v59 = vpop.f32.mrf.mxu3 }
 0x210   :  { %v1262_v61 = vmax.f32 %v1146_v31, 0.0  ;;  %v987_v45 = vpack.c.bf16 %v947_v28, %v946_v23  ;;  %v503_v30 = vpop.f32.mrf.mxu0 }
 0x211   :  { %v792_v33 = vpop.f32.mrf.mxu1 }
 0x212   :  { %v1311_v9 = vpack.c.bf16 %v1262_v61, %v1261_v54  ;;  %1187 = vmatmul.bf16.gmra.mxu2 %v987_v45  ;;  %v793_v49 = vadd.f32 %v792_v33, %v503_v30 }
 0x214   :  { %2515 = vmatmul.msk.bf16.gmra.mxu3 %vm277_vm0, %v1311_v9  ;;  %v884_v53 = vadd.f32 %v3534_v56, %v793_v49  ;;  %v1754_v49 = vmul.f32 %v3616_v6, %v3631_v19 }
 0x215   :  { %v1148_v48 = vpop.f32.mrf.mxu2 }
 0x216   :  { %v1149_v1 = vadd.f32 %v3242_v43, %v1148_v48  ;;  %v948_v55 = vmax.f32 %v884_v53, 0.0  ;;  %v1738_v48 = vmul.f32 %v3332_v29, %v3342_v32  ;;  %2587 = vmatpush.xpose.msk.msrb.mxu2 %vm277_vm0, %v1754_v49 }
 0x217   :  { %v3764_v16 = vpop.f32.mrf.mxu3 }
 0x218   :  { %v505_v51 = vpop.f32.mrf.mxu0  ;;  %v1263_v18 = vmax.f32 %v1149_v1, 0.0  ;;  %2570 = vmatpush.xpose.msk.msrb.mxu3 %vm277_vm0, %v1738_v48 }
 0x219   :  { %v794_v52 = vpop.f32.mrf.mxu1 }
 0x21a   :  { %v795_v0 = vadd.f32 %v794_v52, %v505_v51 }
 0x21c   :  { %v885_v2 = vadd.f32 %v3534_v56, %v795_v0 }
 0x21d   :  { %v1150_v3 = vpop.f32.mrf.mxu2 }
 0x21e   :  { %v949_v57 = vmax.f32 %v885_v2, 0.0  ;;  %v1151_v13 = vadd.f32 %v3242_v43, %v1150_v3  ;;  %v2730_v2 = vld [vmem:[%s4327_s1 + $0xe0] sm:$0xff] }
 0x21f   :  { %v1502_v23 = vpop.f32.mrf.mxu3  ;;  %v2731_v3 = vld [vmem:[%s4326_s0 + $0xe0] sm:$0xff] }
 0x220   :  { %v1264_v21 = vmax.f32 %v1151_v13, 0.0  ;;  %v988_v24 = vpack.c.bf16 %v949_v57, %v948_v55  ;;  %v508_v28 = vpop.f32.mrf.mxu0  ;;  %v1722_v55 = vmul.f32 %v2731_v3, %v2730_v2  ;;  %v1503_v57 = vadd.f32 %v3783_v38, %v1502_v23  ;;  %v3808_v23 = vld [vmem:[%s4332_s6] ss:$0 sm:$0xff] }
 0x221   :  { %v797_v31 = vpop.f32.mrf.mxu1 }
 0x222   :  { %v1312_v10 = vpack.c.bf16 %v1264_v21, %v1263_v18  ;;  %1192 = vmatmul.bf16.gmra.mxu2 %v988_v24  ;;  %v798_v35 = vadd.f32 %v797_v31, %v508_v28  ;;  %2553 = vmatpush.xpose.msk.msrb.mxu1 %vm277_vm0, %v1722_v55 }
 0x224   :  { %2516 = vmatmul.msk.bf16.gmra.mxu3 %vm277_vm0, %v1312_v10  ;;  %v886_v40 = vadd.f32 %v3534_v56, %v798_v35  ;;  %v1501_v10 = vadd.f32 %v3783_v38, %v3764_v16  ;;  %v1643_v35 = vmax.f32 %v1503_v57, 0.0  ;;  %v1498_v16 = vadd.f32 %v3783_v38, %v3745_v59 }
 0x225   :  { %v1153_v36 = vpop.f32.mrf.mxu2 }
 0x226   :  { %v1154_v30 = vadd.f32 %v3242_v43, %v1153_v36  ;;  %v950_v9 = vmax.f32 %v886_v40, 0.0 }
 0x227   :  { %v1505_v37 = vpop.f32.mrf.mxu3 }
 0x228   :  { %v510_v54 = vpop.f32.mrf.mxu0  ;;  %v1265_v39 = vmax.f32 %v1154_v30, 0.0  ;;  %v1506_v6 = vadd.f32 %v3783_v38, %v1505_v37  ;;  %v1642_v30 = vmax.f32 %v1501_v10, 0.0 }
 0x229   :  { %v799_v61 = vpop.f32.mrf.mxu1 }
 0x22a   :  { %v800_v45 = vadd.f32 %v799_v61, %v510_v54  ;;  %v1644_v13 = vmax.f32 %v1506_v6, 0.0 }
 0x22c   :  { %v887_v33 = vadd.f32 %v3534_v56, %v800_v45 }
 0x22d   :  { %v1155_v20 = vpop.f32.mrf.mxu2 }
 0x22e   :  { %v951_v46 = vmax.f32 %v887_v33, 0.0  ;;  %v1156_v47 = vadd.f32 %v3242_v43, %v1155_v20 }
 0x22f   :  { %v1507_v51 = vpop.f32.mrf.mxu3 }
 0x230   :  { %v1266_v4 = vmax.f32 %v1156_v47, 0.0  ;;  %v989_v52 = vpack.c.bf16 %v951_v46, %v950_v9  ;;  %v1508_v43 = vadd.f32 %v3783_v38, %v1507_v51  ;;  %v513_v53 = vpop.f32.mrf.mxu0 }
 0x231   :  { %v802_v29 = vpop.f32.mrf.mxu1 }
 0x232   :  { %v1313_v32 = vpack.c.bf16 %v1266_v4, %v1265_v39  ;;  %1197 = vmatmul.bf16.gmra.mxu2 %v989_v52  ;;  %v1645_v19 = vmax.f32 %v1508_v43, 0.0  ;;  %v803_v1 = vadd.f32 %v802_v29, %v513_v53  ;;  %v1496_v39 = vadd.f32 %v3783_v38, %v3721_v63 }
 0x233   :  { %v1641_v4 = vmax.f32 %v1498_v16, 0.0  ;;  %v1493_v52 = vadd.f32 %v3783_v38, %v3702_v62 }
 0x234   :  { %2517 = vmatmul.msk.bf16.gmra.mxu3 %vm277_vm0, %v1313_v32  ;;  %2601 = vmatpush.xpose.msk.msra.mxu0 %vm2035_vm1, %v1645_v19  ;;  %v888_v28 = vadd.f32 %v3534_v56, %v803_v1  ;;  %v1640_v43 = vmax.f32 %v1496_v39, 0.0  ;;  %v1491_v19 = vadd.f32 %v3783_v38, %v3677_v58  ;;  %v1488_v58 = vadd.f32 %v3783_v38, %v3652_v41 }
 0x235   :  { %v1158_v0 = vpop.f32.mrf.mxu2 }
 0x236   :  { %v1159_v36 = vadd.f32 %v3808_v23, %v1158_v0  ;;  %v952_v54 = vmax.f32 %v888_v28, 0.0  ;;  %v1639_v0 = vmax.f32 %v1493_v52, 0.0  ;;  %v1478_v52 = vadd.f32 %v3783_v38, %v3510_v42 }
 0x237   :  { %v3798_v18 = vpop.f32.mrf.mxu3 }
 0x238   :  { %2602 = vmatpush.xpose.msk.msra.mxu0 %vm2035_vm1, %v1644_v13  ;;  %v515_v21 = vpop.f32.mrf.mxu0  ;;  %v1267_v33 = vmax.f32 %v1159_v36, 0.0  ;;  %v1737_v13 = vmul.f32 %v3310_v5, %v3318_v8 }
 0x239   :  { %v804_v24 = vpop.f32.mrf.mxu1 }
 0x23a   :  { %v805_v31 = vadd.f32 %v804_v24, %v515_v21  ;;  %v1753_v21 = vmul.f32 %v3553_v12, %v3564_v15  ;;  %v1638_v24 = vmax.f32 %v1491_v19, 0.0  ;;  %2571 = vmatpush.xpose.msk.msrb.mxu3 %vm277_vm0, %v1737_v13  ;;  %v1486_v12 = vadd.f32 %v3783_v38, %v3596_v50 }
 0x23b   :  { %v1637_v15 = vmax.f32 %v1488_v58, 0.0 }
 0x23c   :  { %v889_v37 = vadd.f32 %v3534_v56, %v805_v31  ;;  %2603 = vmatpush.xpose.msk.msra.mxu0 %vm2035_vm1, %v1643_v35  ;;  %2588 = vmatpush.xpose.msk.msrb.mxu2 %vm277_vm0, %v1753_v21  ;;  %v1636_v50 = vmax.f32 %v1486_v12, 0.0 }
 0x23d   :  { %v1160_v40 = vpop.f32.mrf.mxu2 }
 0x23e   :  { %v953_v61 = vmax.f32 %v889_v37, 0.0  ;;  %v1161_v45 = vadd.f32 %v3808_v23, %v1160_v40  ;;  %v2733_v40 = vld [vmem:[%s4327_s1 + $0xd8] sm:$0xff] }
 0x23f   :  { %v3816_v20 = vpop.f32.mrf.mxu3 }
 0x240   :  { %v1268_v9 = vmax.f32 %v1161_v45, 0.0  ;;  %v990_v46 = vpack.c.bf16 %v953_v61, %v952_v54  ;;  %2604 = vmatpush.xpose.msk.msra.mxu0 %vm2035_vm1, %v1642_v30  ;;  %v518_v47 = vpop.f32.mrf.mxu0  ;;  %v2734_v54 = vld [vmem:[%s4326_s0 + $0xd8] sm:$0xff]  ;;  %v1483_v45 = vadd.f32 %v3783_v38, %v3575_v34 }
 0x241   :  { %v807_v48 = vpop.f32.mrf.mxu1  ;;  %v1721_v61 = vmul.f32 %v2734_v54, %v2733_v40  ;;  %v1752_v54 = vmul.f32 %v3548_v11, %v3559_v14 }
 0x242   :  { %v1314_v49 = vpack.c.bf16 %v1268_v9, %v1267_v33  ;;  %1202 = vmatmul.bf16.gmra.mxu2 %v990_v46  ;;  %v808_v51 = vadd.f32 %v807_v48, %v518_v47  ;;  %v1481_v47 = vadd.f32 %v3783_v38, %v3527_v60  ;;  %v1635_v48 = vmax.f32 %v1483_v45, 0.0  ;;  %v2739_v45 = vld [vmem:[%s4327_s1 + $0xc8] sm:$0xff] }
 0x243   :  { %2554 = vmatpush.xpose.msk.msrb.mxu1 %vm277_vm0, %v1721_v61  ;;  %2589 = vmatpush.xpose.msk.msrb.mxu2 %vm277_vm0, %v1752_v54  ;;  %v2752_v54 = vld [vmem:[%s4326_s0 + $0x98] sm:$0xff] }
 0x244   :  { %2518 = vmatmul.msk.bf16.gmra.mxu3 %vm277_vm0, %v1314_v49  ;;  %2605 = vmatpush.xpose.msk.msra.mxu0 %vm2035_vm1, %v1641_v4  ;;  %v890_v29 = vadd.f32 %v3534_v56, %v808_v51 }
 0x245   :  { %v1163_v59 = vpop.f32.mrf.mxu2 }
 0x246   :  { %v1164_v1 = vadd.f32 %v3808_v23, %v1163_v59  ;;  %v954_v3 = vmax.f32 %v890_v29, 0.0 }
 0x247   :  { %v3825_v53 = vpop.f32.mrf.mxu3 }
 0x248   :  { %2606 = vmatpush.xpose.msk.msra.mxu0 %vm2035_vm1, %v1640_v43  ;;  %v520_v32 = vpop.f32.mrf.mxu0  ;;  %v1269_v28 = vmax.f32 %v1164_v1, 0.0  ;;  %v1634_v43 = vmax.f32 %v1481_v47, 0.0  ;;  %v1476_v1 = vadd.f32 %v3783_v38, %v3468_v17 }
 0x249   :  { %v809_v6 = vpop.f32.mrf.mxu1 }
 0x24a   :  { %v810_v63 = vadd.f32 %v809_v6, %v520_v32 }
 0x24c   :  { %v891_v2 = vadd.f32 %v3534_v56, %v810_v63  ;;  %2607 = vmatpush.xpose.msk.msra.mxu0 %vm2035_vm1, %v1639_v0 }
 0x24d   :  { %v1165_v62 = vpop.f32.mrf.mxu2 }
 0x24e   :  { %v955_v55 = vmax.f32 %v891_v2, 0.0  ;;  %v1166_v57 = vadd.f32 %v3808_v23, %v1165_v62  ;;  %v1633_v2 = vmax.f32 %v1478_v52, 0.0  ;;  %v1473_v62 = vadd.f32 %v3783_v38, %v3463_v7  ;;  %v2744_v52 = vld [vmem:[%s4326_s0 + $0xb8] sm:$0xff] }
 0x24f   :  { %v3841_v10 = vpop.f32.mrf.mxu3  ;;  %v1471_v7 = vadd.f32 %v3783_v38, %v3445_v44  ;;  %v2738_v44 = vld [vmem:[%s4326_s0 + $0x150] sm:$0xff] }
 0x250   :  { %v1270_v31 = vmax.f32 %v1166_v57, 0.0  ;;  %v991_v35 = vpack.c.bf16 %v955_v55, %v954_v3  ;;  %2608 = vmatpush.xpose.msk.msra.mxu0 %vm2035_vm1, %v1638_v24  ;;  %v523_v36 = vpop.f32.mrf.mxu0  ;;  %v1632_v55 = vmax.f32 %v1476_v1, 0.0  ;;  %v2735_v24 = vld [vmem:[%s4327_s1 + $0xd0] sm:$0xff] }
 0x251   :  { %v812_v5 = vpop.f32.mrf.mxu1  ;;  %v1630_v61 = vmax.f32 %v1471_v7, 0.0  ;;  %v2746_v1 = vld [vmem:[%s4326_s0 + $0xb0] sm:$0xff] }
 0x252   :  { %v1315_v8 = vpack.c.bf16 %v1270_v31, %v1269_v28  ;;  %1207 = vmatmul.bf16.gmra.mxu2 %v991_v35  ;;  %v813_v37 = vadd.f32 %v812_v5, %v523_v36  ;;  %v2736_v28 = vld [vmem:[%s4326_s0 + $0xd0] sm:$0xff]  ;;  %v1631_v35 = vmax.f32 %v1473_v62, 0.0 }
 0x253   :  { %v1720_v31 = vmul.f32 %v2736_v28, %v2735_v24 }
 0x254   :  { %2519 = vmatmul.msk.bf16.gmra.mxu3 %vm277_vm0, %v1315_v8  ;;  %2609 = vmatpush.xpose.msk.msra.mxu0 %vm2035_vm1, %v1637_v15  ;;  %v892_v9 = vadd.f32 %v3534_v56, %v813_v37  ;;  %v2737_v37 = vld [vmem:[%s4327_s1 + $0x150] sm:$0xff] }
 0x255   :  { %v1168_v41 = vpop.f32.mrf.mxu2  ;;  %2555 = vmatpush.xpose.msk.msrb.mxu1 %vm277_vm0, %v1720_v31  ;;  %v1736_v40 = vmul.f32 %v2738_v44, %v2737_v37 }
 0x256   :  { %v1169_v49 = vadd.f32 %v3808_v23, %v1168_v41  ;;  %v956_v4 = vmax.f32 %v892_v9, 0.0 }
 0x257   :  { %v3858_v16 = vpop.f32.mrf.mxu3  ;;  %2572 = vmatpush.xpose.msk.msrb.mxu3 %vm277_vm0, %v1736_v40  ;;  %v2751_v40 = vld [vmem:[%s4327_s1 + $0x98] sm:$0xff] }
 0x258   :  { %2610 = vmatpush.xpose.msk.msra.mxu0 %vm2035_vm1, %v1636_v50  ;;  %v525_v30 = vpop.f32.mrf.mxu0  ;;  %v1271_v29 = vmax.f32 %v1169_v49, 0.0  ;;  %v2740_v50 = vld [vmem:[%s4326_s0 + $0xc8] sm:$0xff]  ;;  %v2741_v49 = vld [vmem:[%s4327_s1 + $0xc0] sm:$0xff] }
 0x259   :  { %v814_v33 = vpop.f32.mrf.mxu1 }
 0x25a   :  { %v815_v46 = vadd.f32 %v814_v33, %v525_v30  ;;  %v1719_v30 = vmul.f32 %v2740_v50, %v2739_v45 }
 0x25c   :  { %v893_v34 = vadd.f32 %v3534_v56, %v815_v46  ;;  %2611 = vmatpush.xpose.msk.msra.mxu0 %vm2035_vm1, %v1635_v48  ;;  %2556 = vmatpush.xpose.msk.msrb.mxu1 %vm277_vm0, %v1719_v30 }
 0x25d   :  { %v1170_v39 = vpop.f32.mrf.mxu2 }
 0x25e   :  { %v957_v51 = vmax.f32 %v893_v34, 0.0  ;;  %v1171_v59 = vadd.f32 %v3808_v23, %v1170_v39  ;;  %v2742_v34 = vld [vmem:[%s4326_s0 + $0xc0] sm:$0xff] }
 0x25f   :  { %v3871_v6 = vpop.f32.mrf.mxu3  ;;  %v1718_v39 = vmul.f32 %v2742_v34, %v2741_v49  ;;  %v2756_v49 = vld [vmem:[%s4326_s0 + $0x148] sm:$0xff] }
 0x260   :  { %v1272_v32 = vmax.f32 %v1171_v59, 0.0  ;;  %v992_v60 = vpack.c.bf16 %v957_v51, %v956_v4  ;;  %2612 = vmatpush.xpose.msk.msra.mxu0 %vm2035_vm1, %v1634_v43  ;;  %v528_v63 = vpop.f32.mrf.mxu0  ;;  %v2743_v59 = vld [vmem:[%s4327_s1 + $0xb8] sm:$0xff] }
 0x261   :  { %v817_v19 = vpop.f32.mrf.mxu1  ;;  %2557 = vmatpush.xpose.msk.msrb.mxu1 %vm277_vm0, %v1718_v39  ;;  %v1717_v43 = vmul.f32 %v2744_v52, %v2743_v59  ;;  %v1751_v39 = vmul.f32 %v3481_v25, %v3491_v27  ;;  %v2758_v25 = vld [vmem:[%s4326_s0 + $0x88] sm:$0xff] }
 0x262   :  { %v1316_v0 = vpack.c.bf16 %v1272_v32, %v1271_v29  ;;  %1212 = vmatmul.bf16.gmra.mxu2 %v992_v60  ;;  %v818_v3 = vadd.f32 %v817_v19, %v528_v63 }
 0x263   :  { %2590 = vmatpush.xpose.msk.msrb.mxu2 %vm277_vm0, %v1751_v39 }
 0x264   :  { %2520 = vmatmul.msk.bf16.gmra.mxu3 %vm277_vm0, %v1316_v0  ;;  %2613 = vmatpush.xpose.msk.msra.mxu0 %vm2035_vm1, %v1633_v2  ;;  %v894_v13 = vadd.f32 %v3534_v56, %v818_v3  ;;  %v2745_v0 = vld [vmem:[%s4327_s1 + $0xb0] sm:$0xff] }
 0x265   :  { %v1173_v42 = vpop.f32.mrf.mxu2  ;;  %2558 = vmatpush.xpose.msk.msrb.mxu1 %vm277_vm0, %v1717_v43  ;;  %v1716_v2 = vmul.f32 %v2746_v1, %v2745_v0 }
 0x266   :  { %v1174_v36 = vadd.f32 %v3808_v23, %v1173_v42  ;;  %v958_v8 = vmax.f32 %v894_v13, 0.0 }
 0x267   :  { %v3880_v57 = vpop.f32.mrf.mxu3 }
 0x268   :  { %2614 = vmatpush.xpose.msk.msra.mxu0 %vm2035_vm1, %v1632_v55  ;;  %v530_v21 = vpop.f32.mrf.mxu0  ;;  %v1273_v33 = vmax.f32 %v1174_v36, 0.0 }
 0x269   :  { %v819_v58 = vpop.f32.mrf.mxu1  ;;  %2559 = vmatpush.xpose.msk.msrb.mxu1 %vm277_vm0, %v1716_v2  ;;  %v2759_v2 = vld [vmem:[%s4327_s1 + $0x80] sm:$0xff] }
 0x26a   :  { %v820_v17 = vadd.f32 %v819_v58, %v530_v21  ;;  %v2747_v58 = vld [vmem:[%s4327_s1 + $0xa8] sm:$0xff] }
 0x26c   :  { %v895_v5 = vadd.f32 %v3534_v56, %v820_v17  ;;  %2615 = vmatpush.xpose.msk.msra.mxu0 %vm2035_vm1, %v1631_v35  ;;  %v2748_v17 = vld [vmem:[%s4326_s0 + $0xa8] sm:$0xff] }
 0x26d   :  { %v1175_v12 = vpop.f32.mrf.mxu2  ;;  %v1715_v24 = vmul.f32 %v2748_v17, %v2747_v58 }
 0x26e   :  { %v959_v15 = vmax.f32 %v895_v5, 0.0  ;;  %v1176_v41 = vadd.f32 %v3808_v23, %v1175_v12  ;;  %v2749_v12 = vld [vmem:[%s4327_s1 + $0xa0] sm:$0xff] }
 0x26f   :  { %v3911_v46 = vpop.f32.mrf.mxu3  ;;  %2560 = vmatpush.xpose.msk.msrb.mxu1 %vm277_vm0, %v1715_v24 }
 0x270   :  { %v1274_v9 = vmax.f32 %v1176_v41, 0.0  ;;  %v993_v47 = vpack.c.bf16 %v959_v15, %v958_v8  ;;  %2616 = vmatpush.xpose.msk.msra.mxu0 %vm2035_vm1, %v1630_v61  ;;  %v533_v11 = vpop.f32.mrf.mxu0  ;;  %v2750_v15 = vld [vmem:[%s4326_s0 + $0xa0] sm:$0xff]  ;;  %v1713_v61 = vmul.f32 %v2752_v54, %v2751_v40 }
 0x271   :  { %v822_v14 = vpop.f32.mrf.mxu1  ;;  %v1714_v41 = vmul.f32 %v2750_v15, %v2749_v12  ;;  %v1750_v15 = vmul.f32 %v3474_v22, %v3486_v26 }
 0x272   :  { %v1317_v48 = vpack.c.bf16 %v1274_v9, %v1273_v33  ;;  %1217 = vmatmul.bf16.gmra.mxu2 %v993_v47  ;;  %v823_v51 = vadd.f32 %v822_v14, %v533_v11  ;;  %v2753_v47 = vld [vmem:[%s4327_s1 + $0x90] sm:$0xff] }
 0x273   :  { %2561 = vmatpush.xpose.msk.msrb.mxu1 %vm277_vm0, %v1714_v41  ;;  %v2754_v11 = vld [vmem:[%s4326_s0 + $0x90] sm:$0xff]  ;;  %2591 = vmatpush.xpose.msk.msrb.mxu2 %vm277_vm0, %v1750_v15  ;;  %v1521_v15 = vadd.f32 %v3783_v38, %v3858_v16  ;;  %v1516_v16 = vadd.f32 %v3783_v38, %v3825_v53 }
 0x274   :  { %2521 = vmatmul.msk.bf16.gmra.mxu3 %vm277_vm0, %v1317_v48  ;;  %v896_v63 = vadd.f32 %v3534_v56, %v823_v51  ;;  %v1712_v14 = vmul.f32 %v2754_v11, %v2753_v47  ;;  %v2755_v48 = vld [vmem:[%s4327_s1 + $0x148] sm:$0xff]  ;;  %v2767_v53 = vld [vmem:[%s4327_s1 + $0x130] sm:$0xff] }
 0x275   :  { %v1178_v4 = vpop.f32.mrf.mxu2  ;;  %v1735_v34 = vmul.f32 %v2756_v49, %v2755_v48 }
 0x276   :  { %v1179_v3 = vadd.f32 %v3808_v23, %v1178_v4  ;;  %v960_v55 = vmax.f32 %v896_v63, 0.0 }
 0x277   :  { %v3931_v29 = vpop.f32.mrf.mxu3  ;;  %2562 = vmatpush.xpose.msk.msrb.mxu1 %vm277_vm0, %v1713_v61  ;;  %2573 = vmatpush.xpose.msk.msrb.mxu3 %vm277_vm0, %v1735_v34 }
 0x278   :  { %v535_v32 = vpop.f32.mrf.mxu0  ;;  %v1275_v28 = vmax.f32 %v1179_v3, 0.0  ;;  %v2760_v3 = vld [vmem:[%s4326_s0 + $0x80] sm:$0xff] }
 0x279   :  { %v824_v60 = vpop.f32.mrf.mxu1 }
 0x27a   :  { %v825_v19 = vadd.f32 %v824_v60, %v535_v32  ;;  %v2757_v60 = vld [vmem:[%s4327_s1 + $0x88] sm:$0xff] }
 0x27b   :  { %2563 = vmatpush.xpose.msk.msrb.mxu1 %vm277_vm0, %v1712_v14  ;;  %v1711_v27 = vmul.f32 %v2758_v25, %v2757_v60 }
 0x27c   :  { %v897_v42 = vadd.f32 %v3534_v56, %v825_v19 }
 0x27d   :  { %v1180_v62 = vpop.f32.mrf.mxu2 }
 0x27e   :  { %v961_v13 = vmax.f32 %v897_v42, 0.0  ;;  %v1181_v21 = vadd.f32 %v3808_v23, %v1180_v62  ;;  %v1710_v42 = vmul.f32 %v2760_v3, %v2759_v2  ;;  %v2764_v2 = vld [vmem:[%s4326_s0 + $0x138] sm:$0xff] }
 0x27f   :  { %v3951_v7 = vpop.f32.mrf.mxu3  ;;  %2564 = vmatpush.xpose.msk.msrb.mxu1 %vm277_vm0, %v1711_v27 }
 0x280   :  { %v1276_v31 = vmax.f32 %v1181_v21, 0.0  ;;  %v994_v35 = vpack.c.bf16 %v961_v13, %v960_v55  ;;  %v538_v36 = vpop.f32.mrf.mxu0 }
 0x281   :  { %v827_v5 = vpop.f32.mrf.mxu1 }
 0x282   :  { %v1318_v8 = vpack.c.bf16 %v1276_v31, %v1275_v28  ;;  %1222 = vmatmul.bf16.gmra.mxu2 %v994_v35  ;;  %v828_v44 = vadd.f32 %v827_v5, %v538_v36  ;;  %v2761_v5 = vld [vmem:[%s4327_s1 + $0x140] sm:$0xff] }
 0x283   :  { %2565 = vmatpush.xpose.msk.msrb.mxu1 %vm277_vm0, %v1710_v42  ;;  %v2766_v42 = vld [vmem:[%s4326_s0 + $0x1b8] sm:$0xff] }
 0x284   :  { %2522 = vmatmul.msk.bf16.gmra.mxu3 %vm277_vm0, %v1318_v8  ;;  %v898_v33 = vadd.f32 %v3534_v56, %v828_v44  ;;  %v2762_v8 = vld [vmem:[%s4326_s0 + $0x140] sm:$0xff] }
 0x285   :  { %v1183_v37 = vpop.f32.mrf.mxu2  ;;  %v1734_v12 = vmul.f32 %v2762_v8, %v2761_v5 }
 0x286   :  { %v1184_v4 = vadd.f32 %v3808_v23, %v1183_v37  ;;  %v962_v52 = vmax.f32 %v898_v33, 0.0 }
 0x287   :  { %v3968_v45 = vpop.f32.mrf.mxu3  ;;  %2574 = vmatpush.xpose.msk.msrb.mxu3 %vm277_vm0, %v1734_v12 }
 0x288   :  { %v540_v50 = vpop.f32.mrf.mxu0  ;;  %v1536_v60 = vadd.f32 %v3783_v38, %v3968_v45  ;;  %v2763_v45 = vld [vmem:[%s4327_s1 + $0x138] sm:$0xff] }
 0x289   :  { %v829_v30 = vpop.f32.mrf.mxu1  ;;  %v1733_v3 = vmul.f32 %v2764_v2, %v2763_v45  ;;  %v2771_v45 = vld [vmem:[%s4327_s1 + $0x128] sm:$0xff] }
 0x28a   :  { %v830_v9 = vadd.f32 %v829_v30, %v540_v50  ;;  %v2772_v2 = vld [vmem:[%s4326_s0 + $0x128] sm:$0xff] }
 0x28b   :  { %2575 = vmatpush.xpose.msk.msrb.mxu3 %vm277_vm0, %v1733_v3  ;;  %v1731_v3 = vmul.f32 %v2772_v2, %v2771_v45 }
 0x28c   :  { %v899_v51 = vadd.f32 %v3534_v56, %v830_v9  ;;  %v1277_v56 = vmax.f32 %v1184_v4, 0.0 }
 0x28d   :  { %v1185_v59 = vpop.f32.mrf.mxu2 }
 0x28e   :  { %v963_v43 = vmax.f32 %v899_v51, 0.0  ;;  %v1186_v32 = vadd.f32 %v3808_v23, %v1185_v59 }
 0x28f   :  { %v1537_v19 = vpop.f32.mrf.mxu3 }
 0x290   :  { %v1278_v63 = vmax.f32 %v1186_v32, 0.0  ;;  %v995_v0 = vpack.c.bf16 %v963_v43, %v962_v52  ;;  %v1538_v4 = vadd.f32 %v3783_v38, %v1537_v19 }
 0x292   :  { %v1319_v1 = vpack.c.bf16 %v1278_v63, %v1277_v56  ;;  %1227 = vmatmul.bf16.gmra.mxu2 %v995_v0  ;;  %v1657_v25 = vmax.f32 %v1538_v4, 0.0  ;;  %v1533_v56 = vadd.f32 %v3783_v38, %v3951_v7  ;;  %v1656_v63 = vmax.f32 %v1536_v60, 0.0  ;;  %v2765_v7 = vld [vmem:[%s4327_s1 + $0x1b8] sm:$0xff] }
 0x293   :  { %v1531_v0 = vadd.f32 %v3783_v38, %v3931_v29 }
 0x294   :  { %2523 = vmatmul.msk.bf16.gmra.mxu3 %vm277_vm0, %v1319_v1  ;;  %v1655_v1 = vmax.f32 %v1533_v56, 0.0 }
 0x295   :  { %v1188_v62 = vpop.f32.mrf.mxu2 }
 0x296   :  { %v1189_v13 = vadd.f32 %v3808_v23, %v1188_v62  ;;  %v1749_v62 = vmul.f32 %v2766_v42, %v2765_v7 }
 0x297   :  { %v1540_v55 = vpop.f32.mrf.mxu3 }
 0x298   :  { %v1279_v17 = vmax.f32 %v1189_v13, 0.0  ;;  %v1541_v14 = vadd.f32 %v3783_v38, %v1540_v55  ;;  %2592 = vmatpush.xpose.msk.msrb.mxu2 %vm277_vm0, %v1749_v62 }
 0x29a   :  { %v1658_v51 = vmax.f32 %v1541_v14, 0.0 }
 0x29d   :  { %v1190_v21 = vpop.f32.mrf.mxu2 }
 0x29e   :  { %v1191_v58 = vadd.f32 %v3808_v23, %v1190_v21  ;;  %v1528_v21 = vadd.f32 %v3783_v38, %v3911_v46  ;;  %v1523_v46 = vadd.f32 %v3783_v38, %v3871_v6  ;;  %v1650_v6 = vmax.f32 %v1521_v15, 0.0  ;;  %v2780_v15 = vld [vmem:[%s4326_s0 + $0x1a8] sm:$0xff] }
 0x29f   :  { %v1542_v28 = vpop.f32.mrf.mxu3 }
 0x2a0   :  { %v1280_v24 = vmax.f32 %v1191_v58, 0.0  ;;  %v1543_v26 = vadd.f32 %v3783_v38, %v1542_v28  ;;  %v1654_v58 = vmax.f32 %v1531_v0, 0.0 }
 0x2a2   :  { %v1320_v31 = vpack.c.bf16 %v1280_v24, %v1279_v17  ;;  %v1659_v48 = vmax.f32 %v1543_v26, 0.0 }
 0x2a4   :  { %2524 = vmatmul.msk.bf16.gmra.mxu3 %vm277_vm0, %v1320_v31 }
 0x2a5   :  { %v1193_v35 = vpop.f32.mrf.mxu2 }
 0x2a6   :  { %v1194_v41 = vadd.f32 %v3808_v23, %v1193_v35  ;;  %v1526_v35 = vadd.f32 %v3783_v38, %v3880_v57 }
 0x2a7   :  { %v1545_v36 = vpop.f32.mrf.mxu3 }
 0x2a8   :  { %v1281_v40 = vmax.f32 %v1194_v41, 0.0  ;;  %v1546_v33 = vadd.f32 %v3783_v38, %v1545_v36  ;;  %v1653_v36 = vmax.f32 %v1528_v21, 0.0  ;;  %v1652_v8 = vmax.f32 %v1526_v35, 0.0 }
 0x2a9   :  { %v1651_v41 = vmax.f32 %v1523_v46, 0.0 }
 0x2aa   :  { %v1660_v47 = vmax.f32 %v1546_v33, 0.0 }
 0x2ad   :  { %v1195_v37 = vpop.f32.mrf.mxu2 }
 0x2ae   :  { %v1196_v44 = vadd.f32 %v3808_v23, %v1195_v37 }
 0x2af   :  { %v1547_v61 = vpop.f32.mrf.mxu3 }
 0x2b0   :  { %v1282_v54 = vmax.f32 %v1196_v44, 0.0  ;;  %v1548_v50 = vadd.f32 %v3783_v38, %v1547_v61 }
 0x2b2   :  { %v1321_v30 = vpack.c.bf16 %v1282_v54, %v1281_v40  ;;  %v1661_v9 = vmax.f32 %v1548_v50, 0.0  ;;  %v1518_v40 = vadd.f32 %v3783_v38, %v3841_v10  ;;  %v1513_v10 = vadd.f32 %v3783_v38, %v3816_v20  ;;  %v2769_v20 = vld [vmem:[%s4327_s1 + $0x1b0] sm:$0xff] }
 0x2b4   :  { %2525 = vmatmul.msk.bf16.gmra.mxu3 %vm277_vm0, %v1321_v30  ;;  %2618 = vmatpush.xpose.msk.msra.mxu1 %vm2035_vm1, %v1661_v9  ;;  %v1649_v33 = vmax.f32 %v1518_v40, 0.0  ;;  %v1647_v14 = vmax.f32 %v1513_v10, 0.0  ;;  %v2781_v40 = vld [vmem:[%s4327_s1 + $0x108] sm:$0xff]  ;;  %v2784_v10 = vld [vmem:[%s4326_s0 + $0x100] sm:$0xff] }
 0x2b5   :  { %v1198_v22 = vpop.f32.mrf.mxu2 }
 0x2b6   :  { %v1199_v49 = vadd.f32 %v3808_v23, %v1198_v22  ;;  %v1648_v22 = vmax.f32 %v1516_v16, 0.0 }
 0x2b7   :  { %v4027_v11 = vpop.f32.mrf.mxu3 }
 0x2b8   :  { %2619 = vmatpush.xpose.msk.msra.mxu1 %vm2035_vm1, %v1660_v47  ;;  %v1283_v59 = vmax.f32 %v1199_v49, 0.0  ;;  %v1511_v47 = vadd.f32 %v3783_v38, %v3798_v18 }
 0x2bc   :  { %2620 = vmatpush.xpose.msk.msra.mxu1 %vm2035_vm1, %v1659_v48  ;;  %v2768_v48 = vld [vmem:[%s4326_s0 + $0x130] sm:$0xff] }
 0x2bd   :  { %v1200_v34 = vpop.f32.mrf.mxu2  ;;  %v1732_v49 = vmul.f32 %v2768_v48, %v2767_v53 }
 0x2be   :  { %v1201_v39 = vadd.f32 %v3808_v23, %v1200_v34  ;;  %v2770_v34 = vld [vmem:[%s4326_s0 + $0x1b0] sm:$0xff] }
 0x2bf   :  { %v4035_v43 = vpop.f32.mrf.mxu3  ;;  %2576 = vmatpush.xpose.msk.msrb.mxu3 %vm277_vm0, %v1732_v49 }
 0x2c0   :  { %v1284_v52 = vmax.f32 %v1201_v39, 0.0  ;;  %2621 = vmatpush.xpose.msk.msra.mxu1 %vm2035_vm1, %v1658_v51  ;;  %v1748_v39 = vmul.f32 %v2770_v34, %v2769_v20 }
 0x2c2   :  { %v1322_v32 = vpack.c.bf16 %v1284_v52, %v1283_v59  ;;  %2593 = vmatpush.xpose.msk.msrb.mxu2 %vm277_vm0, %v1748_v39  ;;  %v1646_v59 = vmax.f32 %v1511_v47, 0.0 }
 0x2c3   :  { %2577 = vmatpush.xpose.msk.msrb.mxu3 %vm277_vm0, %v1731_v3 }
 0x2c4   :  { %2526 = vmatmul.msk.bf16.gmra.mxu3 %vm277_vm0, %v1322_v32  ;;  %2622 = vmatpush.xpose.msk.msra.mxu1 %vm2035_vm1, %v1657_v25 }
 0x2c5   :  { %v1203_v27 = vpop.f32.mrf.mxu2 }
 0x2c6   :  { %v1204_v29 = vadd.f32 %v3808_v23, %v1203_v27 }
 0x2c7   :  { %v4044_v19 = vpop.f32.mrf.mxu3 }
 0x2c8   :  { %2623 = vmatpush.xpose.msk.msra.mxu1 %vm2035_vm1, %v1656_v63  ;;  %v1285_v17 = vmax.f32 %v1204_v29, 0.0 }
 0x2cc   :  { %2624 = vmatpush.xpose.msk.msra.mxu1 %vm2035_vm1, %v1655_v1 }
 0x2cd   :  { %v1205_v55 = vpop.f32.mrf.mxu2 }
 0x2ce   :  { %v1206_v13 = vadd.f32 %v3808_v23, %v1205_v55  ;;  %v2773_v55 = vld [vmem:[%s4327_s1 + $0x120] sm:$0xff] }
 0x2cf   :  { %v4068_v28 = vpop.f32.mrf.mxu3 }
 0x2d0   :  { %v1286_v24 = vmax.f32 %v1206_v13, 0.0  ;;  %2625 = vmatpush.xpose.msk.msra.mxu1 %vm2035_vm1, %v1654_v58  ;;  %v2774_v13 = vld [vmem:[%s4326_s0 + $0x120] sm:$0xff] }
 0x2d1   :  { %v1730_v21 = vmul.f32 %v2774_v13, %v2773_v55 }
 0x2d2   :  { %v1323_v31 = vpack.c.bf16 %v1286_v24, %v1285_v17  ;;  %v2775_v17 = vld [vmem:[%s4327_s1 + $0x118] sm:$0xff] }
 0x2d3   :  { %2578 = vmatpush.xpose.msk.msrb.mxu3 %vm277_vm0, %v1730_v21  ;;  %v2776_v24 = vld [vmem:[%s4326_s0 + $0x118] sm:$0xff] }
 0x2d4   :  { %2527 = vmatmul.msk.bf16.gmra.mxu3 %vm277_vm0, %v1323_v31  ;;  %2626 = vmatpush.xpose.msk.msra.mxu1 %vm2035_vm1, %v1653_v36  ;;  %v1729_v31 = vmul.f32 %v2776_v24, %v2775_v17  ;;  %v2777_v36 = vld [vmem:[%s4327_s1 + $0x110] sm:$0xff] }
 0x2d5   :  { %v1208_v5 = vpop.f32.mrf.mxu2 }
 0x2d6   :  { %v1209_v57 = vadd.f32 %v3808_v23, %v1208_v5  ;;  %v2778_v5 = vld [vmem:[%s4326_s0 + $0x110] sm:$0xff] }
 0x2d7   :  { %v4077_v12 = vpop.f32.mrf.mxu3  ;;  %2579 = vmatpush.xpose.msk.msrb.mxu3 %vm277_vm0, %v1729_v31  ;;  %v1728_v46 = vmul.f32 %v2778_v5, %v2777_v36  ;;  %v2787_v31 = vld [vmem:[%s4327_s1 + $0x198] sm:$0xff] }
 0x2d8   :  { %2627 = vmatpush.xpose.msk.msra.mxu1 %vm2035_vm1, %v1652_v8  ;;  %v1287_v54 = vmax.f32 %v1209_v57, 0.0  ;;  %v2779_v8 = vld [vmem:[%s4327_s1 + $0x1a8] sm:$0xff] }
 0x2db   :  { %2580 = vmatpush.xpose.msk.msrb.mxu3 %vm277_vm0, %v1728_v46 }
 0x2dc   :  { %2628 = vmatpush.xpose.msk.msra.mxu1 %vm2035_vm1, %v1651_v41  ;;  %v1747_v41 = vmul.f32 %v2780_v15, %v2779_v8 }
 0x2dd   :  { %v1210_v37 = vpop.f32.mrf.mxu2 }
 0x2de   :  { %v1211_v44 = vadd.f32 %v3808_v23, %v1210_v37  ;;  %2594 = vmatpush.xpose.msk.msrb.mxu2 %vm277_vm0, %v1747_v41 }
 0x2df   :  { %v4087_v50 = vpop.f32.mrf.mxu3 }
 0x2e0   :  { %v1288_v61 = vmax.f32 %v1211_v44, 0.0  ;;  %2629 = vmatpush.xpose.msk.msra.mxu1 %vm2035_vm1, %v1650_v6  ;;  %v2782_v6 = vld [vmem:[%s4326_s0 + $0x108] sm:$0xff]  ;;  %v1563_v15 = vadd.f32 %v3783_v38, %v4087_v50  ;;  %v1556_v50 = vadd.f32 %v3783_v38, %v4044_v19  ;;  %v2790_v19 = vld [vmem:[%s4326_s0 + $0x190] sm:$0xff] }
 0x2e2   :  { %v1324_v30 = vpack.c.bf16 %v1288_v61, %v1287_v54  ;;  %v1727_v54 = vmul.f32 %v2782_v6, %v2781_v40 }
 0x2e4   :  { %2528 = vmatmul.msk.bf16.gmra.mxu3 %vm277_vm0, %v1324_v30  ;;  %2630 = vmatpush.xpose.msk.msra.mxu1 %vm2035_vm1, %v1649_v33 }
 0x2e5   :  { %v1213_v9 = vpop.f32.mrf.mxu2  ;;  %2581 = vmatpush.xpose.msk.msrb.mxu3 %vm277_vm0, %v1727_v54  ;;  %v1664_v54 = vmax.f32 %v1556_v50, 0.0 }
 0x2e6   :  { %v1214_v18 = vadd.f32 %v3808_v23, %v1213_v9  ;;  %v2783_v9 = vld [vmem:[%s4327_s1 + $0x100] sm:$0xff] }
 0x2e7   :  { %v4096_v26 = vpop.f32.mrf.mxu3 }
 0x2e8   :  { %2631 = vmatpush.xpose.msk.msra.mxu1 %vm2035_vm1, %v1648_v22  ;;  %v1289_v52 = vmax.f32 %v1214_v18, 0.0  ;;  %v1726_v22 = vmul.f32 %v2784_v10, %v2783_v9 }
 0x2ea   :  { %2582 = vmatpush.xpose.msk.msrb.mxu3 %vm277_vm0, %v1726_v22 }
 0x2ec   :  { %2632 = vmatpush.xpose.msk.msra.mxu1 %vm2035_vm1, %v1647_v14 }
 0x2ed   :  { %v1215_v4 = vpop.f32.mrf.mxu2 }
 0x2ee   :  { %v1216_v51 = vadd.f32 %v3808_v23, %v1215_v4 }
 0x2ef   :  { %v4118_v60 = vpop.f32.mrf.mxu3 }
 0x2f0   :  { %v1290_v32 = vmax.f32 %v1216_v51, 0.0  ;;  %2633 = vmatpush.xpose.msk.msra.mxu1 %vm2035_vm1, %v1646_v59  ;;  %v2785_v51 = vld [vmem:[%s4327_s1 + $0x1a0] sm:$0xff] }
 0x2f1   :  { %v2786_v59 = vld [vmem:[%s4326_s0 + $0x1a0] sm:$0xff] }
 0x2f2   :  { %v1325_v25 = vpack.c.bf16 %v1290_v32, %v1289_v52  ;;  %v1746_v52 = vmul.f32 %v2786_v59, %v2785_v51 }
 0x2f4   :  { %2529 = vmatmul.msk.bf16.gmra.mxu3 %vm277_vm0, %v1325_v25  ;;  %2595 = vmatpush.xpose.msk.msrb.mxu2 %vm277_vm0, %v1746_v52 }
 0x2f5   :  { %v1218_v27 = vpop.f32.mrf.mxu2 }
 0x2f6   :  { %v1219_v63 = vadd.f32 %v3808_v23, %v1218_v27 }
 0x2f7   :  { %v4122_v56 = vpop.f32.mrf.mxu3 }
 0x2f8   :  { %v1291_v7 = vmax.f32 %v1219_v63, 0.0  ;;  %v1571_v17 = vadd.f32 %v3783_v38, %v4122_v56  ;;  %v1566_v56 = vadd.f32 %v3783_v38, %v4096_v26  ;;  %v1558_v26 = vadd.f32 %v3783_v38, %v4068_v28 }
 0x2f9   :  { %v1551_v28 = vadd.f32 %v3783_v38, %v4027_v11 }
 0x2fa   :  { %v1670_v5 = vmax.f32 %v1571_v17, 0.0  ;;  %v1668_v41 = vmax.f32 %v1566_v56, 0.0  ;;  %v1665_v6 = vmax.f32 %v1558_v26, 0.0 }
 0x2fd   :  { %v1220_v0 = vpop.f32.mrf.mxu2 }
 0x2fe   :  { %v1221_v1 = vadd.f32 %v3808_v23, %v1220_v0 }
 0x2ff   :  { %v4132_v62 = vpop.f32.mrf.mxu3 }
 0x300   :  { %v1292_v42 = vmax.f32 %v1221_v1, 0.0  ;;  %v1573_v13 = vadd.f32 %v3783_v38, %v4132_v62  ;;  %v1568_v62 = vadd.f32 %v3783_v38, %v4118_v60  ;;  %v1561_v60 = vadd.f32 %v3783_v38, %v4077_v12 }
 0x301   :  { %v1553_v12 = vadd.f32 %v3783_v38, %v4035_v43  ;;  %v1662_v43 = vmax.f32 %v1551_v28, 0.0 }
 0x302   :  { %v1326_v29 = vpack.c.bf16 %v1292_v42, %v1291_v7  ;;  %v1671_v24 = vmax.f32 %v1573_v13, 0.0  ;;  %v1669_v8 = vmax.f32 %v1568_v62, 0.0  ;;  %v1758_v13 = vld [vmem:[%s4335_s9] sm:$0xff] }
 0x303   :  { %v2311_v62 = vld [vmem:[#allocation2] sm:$0x1] }
 0x304   :  { %2530 = vmatmul.msk.bf16.gmra.mxu3 %vm277_vm0, %v1326_v29 }
 0x305   :  { %v1223_v58 = vpop.f32.mrf.mxu2 }
 0x306   :  { %v1224_v57 = vadd.f32 %v3808_v23, %v1223_v58 }
 0x307   :  { %v1575_v35 = vpop.f32.mrf.mxu3 }
 0x308   :  { %v1293_v61 = vmax.f32 %v1224_v57, 0.0  ;;  %v1576_v29 = vadd.f32 %v3783_v38, %v1575_v35  ;;  %v2788_v35 = vld [vmem:[%s4326_s0 + $0x198] sm:$0xff] }
 0x309   :  { %v1745_v36 = vmul.f32 %v2788_v35, %v2787_v31 }
 0x30a   :  { %v1672_v21 = vmax.f32 %v1576_v29, 0.0 }
 0x30b   :  { %2596 = vmatpush.xpose.msk.msrb.mxu2 %vm277_vm0, %v1745_v36 }
 0x30d   :  { %v1225_v37 = vpop.f32.mrf.mxu2 }
 0x30e   :  { %v1226_v44 = vadd.f32 %v3808_v23, %v1225_v37  ;;  %v1667_v37 = vmax.f32 %v1563_v15, 0.0  ;;  %v2795_v15 = vld [vmem:[%s4334_s8] ss:$0 sm:$0xff]  ;;  %s2823_s8 = smov [#allocation3]  }
 0x30f   :  { %v1577_v16 = vpop.f32.mrf.mxu3  ;;  %s2346_s20 = sshll.u32 %s2823_s8, 4  ;;  %s2347_s20 = int_to_ptr.vmem [resolvable:$true] %s2346_s20 }
 0x310   :  { %v1294_v30 = vmax.f32 %v1226_v44, 0.0  ;;  %v1578_v3 = vadd.f32 %v3783_v38, %v1577_v16  ;;  %v1666_v44 = vmax.f32 %v1561_v60, 0.0  ;;  %v2789_v16 = vld [vmem:[%s4327_s1 + $0x190] sm:$0xff] }
 0x312   :  { %v1327_v33 = vpack.c.bf16 %v1294_v30, %v1293_v61  ;;  %v1673_v55 = vmax.f32 %v1578_v3, 0.0  ;;  %v1663_v30 = vmax.f32 %v1553_v12, 0.0 }
 0x314   :  { %2531 = vmatmul.msk.bf16.gmra.mxu3 %vm277_vm0, %v1327_v33  ;;  %v1744_v33 = vmul.f32 %v2790_v19, %v2789_v16 }
 0x315   :  { %v1228_v47 = vpop.f32.mrf.mxu2 }
 0x316   :  { %v1229_v53 = vadd.f32 %v3808_v23, %v1228_v47  ;;  %2597 = vmatpush.xpose.msk.msrb.mxu2 %vm277_vm0, %v1744_v33  ;;  %v2791_v47 = vld [vmem:[%s4327_s1 + $0x188] sm:$0xff] }
 0x317   :  { %v1580_v14 = vpop.f32.mrf.mxu3 }
 0x318   :  { %v1295_v20 = vmax.f32 %v1229_v53, 0.0  ;;  %v1581_v45 = vadd.f32 %v3783_v38, %v1580_v14  ;;  %v2792_v14 = vld [vmem:[%s4326_s0 + $0x188] sm:$0xff] }
 0x319   :  { %v1743_v53 = vmul.f32 %v2792_v14, %v2791_v47  ;;  %v2336_v47 = vlaneseq }
 0x31a   :  { %v1674_v7 = vmax.f32 %v1581_v45, 0.0 }
 0x31b   :  { %2598 = vmatpush.xpose.msk.msrb.mxu2 %vm277_vm0, %v1743_v53  ;;  %vm2338_vm5 = vcmp.lt.s32.totalorder %v2336_v47, 512 }
 0x31d   :  { %v1230_v48 = vpop.f32.mrf.mxu2 }
 0x31e   :  { %v1231_v49 = vadd.f32 %v3808_v23, %v1230_v48 }
 0x31f   :  { %v1582_v39 = vpop.f32.mrf.mxu3 }
 0x320   :  { %v1296_v34 = vmax.f32 %v1231_v49, 0.0  ;;  %v1583_v63 = vadd.f32 %v3783_v38, %v1582_v39  ;;  %v2793_v49 = vld [vmem:[%s4327_s1 + $0x180] sm:$0xff] }
 0x322   :  { %v1328_v18 = vpack.c.bf16 %v1296_v34, %v1295_v20  ;;  %v1675_v2 = vmax.f32 %v1583_v63, 0.0  ;;  %v2794_v20 = vld [vmem:[%s4326_s0 + $0x180] sm:$0xff] }
 0x323   :  { %v1742_v34 = vmul.f32 %v2794_v20, %v2793_v49 }
 0x324   :  { %2532 = vmatmul.msk.bf16.gmra.mxu3 %vm277_vm0, %v1328_v18 }
 0x325   :  { %2599 = vmatpush.xpose.msk.msrb.mxu2 %vm277_vm0, %v1742_v34 }
 0x327   :  { %v1585_v4 = vpop.f32.mrf.mxu3 }
 0x328   :  { %v1586_v25 = vadd.f32 %v3783_v38, %v1585_v4 }
 0x32a   :  { %v1676_v0 = vmax.f32 %v1586_v25, 0.0 }
 0x32f   :  { %v1587_v32 = vpop.f32.mrf.mxu3 }
 0x330   :  { %v1588_v23 = vadd.f32 %v3783_v38, %v1587_v32 }
 0x332   :  { %v1677_v27 = vmax.f32 %v1588_v23, 0.0 }
 0x334   :  { %2635 = vmatpush.xpose.msk.msra.mxu3 %vm2035_vm1, %v1677_v27 }
 0x337   :  { %v4195_v1 = vpop.f32.mrf.mxu3 }
 0x338   :  { %2636 = vmatpush.xpose.msk.msra.mxu3 %vm2035_vm1, %v1676_v0 }
 0x33c   :  { %2637 = vmatpush.xpose.msk.msra.mxu3 %vm2035_vm1, %v1675_v2  ;;  %v1759_v2 = vld [vmem:[%s4336_s10] sm:$0xff] }
 0x33d   :  { %2583 = vmatmul.msk.f32.vlgmr.msrb.gmra.mxu3 %vm277_vm0, %v1759_v2  ;;  %2566 = vmatmul.msk.f32.vlgmr.msrb.gmra.mxu1 %vm277_vm0, %v1759_v2 }
 0x33e   :  { %2549 = vmatmul.msk.f32.vlgmr.msrb.gmra.mxu0 %vm277_vm0, %v1759_v2  ;;  %2600 = vmatmul.msk.f32.vlgmr.msrb.gmra.mxu2 %vm277_vm0, %v1759_v2 }
 0x33f   :  { %v4201_v42 = vpop.f32.mrf.mxu3 }
 0x340   :  { %2638 = vmatpush.xpose.msk.msra.mxu3 %vm2035_vm1, %v1674_v7 }
 0x344   :  { %2639 = vmatpush.xpose.msk.msra.mxu3 %vm2035_vm1, %v1673_v55 }
 0x345   :  { %2634 = vmatmul.msk.f32.vlgmr.msra.gmra.mxu1 %vm2035_vm1, %v1758_v13 }
 0x346   :  { %2617 = vmatmul.msk.f32.vlgmr.msra.gmra.mxu0 %vm2035_vm1, %v1758_v13 }
 0x347   :  { %v4208_v58 = vpop.f32.mrf.mxu3 }
 0x348   :  { %2640 = vmatpush.xpose.msk.msra.mxu3 %vm2035_vm1, %v1672_v21 }
 0x34c   :  { %2641 = vmatpush.xpose.msk.msra.mxu3 %vm2035_vm1, %v1671_v24 }
 0x34f   :  { %v4223_v46 = vpop.f32.mrf.mxu3 }
 0x350   :  { %2642 = vmatpush.xpose.msk.msra.mxu3 %vm2035_vm1, %v1670_v5  ;;  %v2822_v5 = vmov 0  }
 0x351   :  { %2691 = vset.pattern.permute.xlu0 %v2822_v5 }
 0x352   :  { %2314 = vperm.xlu0 %2691, %v2311_v62  }
 0x354   :  { %2643 = vmatpush.xpose.msk.msra.mxu3 %vm2035_vm1, %v1669_v8 }
 0x357   :  { %v4231_v57 = vpop.f32.mrf.mxu3 }
 0x358   :  { %2644 = vmatpush.xpose.msk.msra.mxu3 %vm2035_vm1, %v1668_v41  ;;  %v1601_v41 = vadd.f32 %v2795_v15, %v4231_v57  ;;  %v1591_v57 = vadd.f32 %v2795_v15, %v4195_v1 }
 0x35a   :  { %v1682_v26 = vmax.f32 %v1601_v41, 0.0  ;;  %v1678_v12 = vmax.f32 %v1591_v57, 0.0 }
 0x35c   :  { %2645 = vmatpush.xpose.msk.msra.mxu3 %vm2035_vm1, %v1667_v37  ;;  %v1598_v37 = vadd.f32 %v2795_v15, %v4223_v46 }
 0x35f   :  { %v4239_v40 = vpop.f32.mrf.mxu3 }
 0x360   :  { %2646 = vmatpush.xpose.msk.msra.mxu3 %vm2035_vm1, %v1666_v44  ;;  %v1603_v56 = vadd.f32 %v3783_v38, %v4239_v40  ;;  %v1596_v44 = vadd.f32 %v2795_v15, %v4208_v58  ;;  %v1593_v40 = vadd.f32 %v2795_v15, %v4201_v42 }
 0x362   :  { %v1683_v60 = vmax.f32 %v1603_v56, 0.0  ;;  %v1680_v50 = vmax.f32 %v1596_v44, 0.0 }
 0x364   :  { %2647 = vmatpush.xpose.msk.msra.mxu3 %vm2035_vm1, %v1665_v6  ;;  %v1679_v6 = vmax.f32 %v1593_v40, 0.0 }
 0x367   :  { %v1605_v61 = vpop.f32.mrf.mxu3 }
 0x368   :  { %2648 = vmatpush.xpose.msk.msra.mxu3 %vm2035_vm1, %v1664_v54  ;;  %v1606_v35 = vadd.f32 %v3783_v38, %v1605_v61 }
 0x36a   :  { %v1684_v8 = vmax.f32 %v1606_v35, 0.0 }
 0x36c   :  { %2649 = vmatpush.xpose.msk.msra.mxu3 %vm2035_vm1, %v1663_v30 }
 0x36f   :  { %v1607_v9 = vpop.f32.mrf.mxu3 }
 0x370   :  { %2650 = vmatpush.xpose.msk.msra.mxu3 %vm2035_vm1, %v1662_v43  ;;  %v1608_v24 = vadd.f32 %v3783_v38, %v1607_v9 }
 0x372   :  { %v1685_v36 = vmax.f32 %v1608_v24, 0.0 }
 0x373   :  { %2651 = vmatmul.msk.f32.vlgmr.msra.gmra.mxu3 %vm2035_vm1, %v1758_v13 }
 0x377   :  { %v1610_v10 = vpop.f32.mrf.mxu3 }
 0x378   :  { %v1611_v21 = vadd.f32 %v3783_v38, %v1610_v10 }
 0x37a   :  { %v1686_v31 = vmax.f32 %v1611_v21, 0.0 }
 0x37f   :  { %v1612_v11 = vpop.f32.mrf.mxu3 }
 0x380   :  { %v1613_v29 = vadd.f32 %v3783_v38, %v1612_v11 }
 0x382   :  { %v1687_v17 = vmax.f32 %v1613_v29, 0.0 }
 0x387   :  { %v1615_v22 = vpop.f32.mrf.mxu3 }
 0x388   :  { %v1616_v3 = vadd.f32 %v3783_v38, %v1615_v22 }
 0x38a   :  { %v1688_v55 = vmax.f32 %v1616_v3, 0.0 }
 0x38f   :  { %v1617_v48 = vpop.f32.mrf.mxu3 }
 0x390   :  { %v1618_v0 = vadd.f32 %v3783_v38, %v1617_v48 }
 0x392   :  { %v1689_v7 = vmax.f32 %v1618_v0, 0.0 }
 0x397   :  { %v1620_v39 = vpop.f32.mrf.mxu3 }
 0x398   :  { %v1621_v27 = vadd.f32 %v3783_v38, %v1620_v39 }
 0x39a   :  { %v1690_v45 = vmax.f32 %v1621_v27, 0.0 }
 0x39f   :  { %v1622_v18 = vpop.f32.mrf.mxu3 }
 0x3a0   :  { %v1623_v23 = vadd.f32 %v3783_v38, %v1622_v18 }
 0x3a2   :  { %v1691_v63 = vmax.f32 %v1623_v23, 0.0 }
 0x3a7   :  { %v1625_v4 = vpop.f32.mrf.mxu3 }
 0x3a8   :  { %v1626_v52 = vadd.f32 %v3783_v38, %v1625_v4 }
 0x3aa   :  { %v1692_v25 = vmax.f32 %v1626_v52, 0.0 }
 0x3af   :  { %v1627_v51 = vpop.f32.mrf.mxu3 }
 0x3b0   :  { %v1628_v59 = vadd.f32 %v3783_v38, %v1627_v51  ;;  %v1681_v38 = vmax.f32 %v1598_v37, 0.0 }
 0x3b2   :  { %v1693_v32 = vmax.f32 %v1628_v59, 0.0 }
 0x3b4   :  { %2652 = vmatpush.xpose.msk.msra.mxu2 %vm2035_vm1, %v1693_v32 }
 0x3b8   :  { %2653 = vmatpush.xpose.msk.msra.mxu2 %vm2035_vm1, %v1692_v25 }
 0x3ba   :  { %v1992_v46 = vpop.f32.mrf.mxu1 }
 0x3bb   :  { %v1972_v54 = vpop.f32.mrf.mxu0 }
 0x3bc   :  { %2654 = vmatpush.xpose.msk.msra.mxu2 %vm2035_vm1, %v1691_v63 }
 0x3c0   :  { %2655 = vmatpush.xpose.msk.msra.mxu2 %vm2035_vm1, %v1690_v45  ;;  %v2012_v58 = vpop.f32.mrf.mxu3 }
 0x3c1   :  { %v2032_v61 = vpop.f32.mrf.mxu2 }
 0x3c2   :  { %v2268_v30 = vpop.f32.mrf.mxu1 }
 0x3c3   :  { %v2269_v19 = vadd.f32 %v2268_v30, %v1992_v46  ;;  %v2248_v33 = vpop.f32.mrf.mxu0 }
 0x3c4   :  { %2656 = vmatpush.xpose.msk.msra.mxu2 %vm2035_vm1, %v1689_v7  ;;  %v2315_v28 = vpop.permute.xlu0 %2314  ;;  %v2249_v9 = vadd.f32 %v2248_v33, %v1972_v54 }
 0x3c5   :  { %v2317_v16 = vperm.slane %v2315_v28, 0 }
 0x3c7   :  { %v2319_v1 = vadd.f32 %v2317_v16, %v2269_v19  ;;  %v2318_v53 = vadd.f32 %v2317_v16, %v2249_v9 }
 0x3c8   :  { %2657 = vmatpush.xpose.msk.msra.mxu2 %vm2035_vm1, %v1688_v55 }
 0x3c9   :  { %v2326_v14 = vrot.slane %v2319_v1, 7 }
 0x3cb   :  { %v2330_v34 = vsel %vm2329_vm2, %v2318_v53, %v2326_v14 }
 0x3cc   :  { %2658 = vmatpush.xpose.msk.msra.mxu2 %vm2035_vm1, %v1687_v17 }
 0x3d0   :  { %2659 = vmatpush.xpose.msk.msra.mxu2 %vm2035_vm1, %v1686_v31 }
 0x3d4   :  { %2660 = vmatpush.xpose.msk.msra.mxu2 %vm2035_vm1, %v1685_v36 }
 0x3d8   :  { %2661 = vmatpush.xpose.msk.msra.mxu2 %vm2035_vm1, %v1684_v8 }
 0x3dc   :  { %2662 = vmatpush.xpose.msk.msra.mxu2 %vm2035_vm1, %v1683_v60 }
 0x3e0   :  { %2663 = vmatpush.xpose.msk.msra.mxu2 %vm2035_vm1, %v1682_v26 }
 0x3e4   :  { %2664 = vmatpush.xpose.msk.msra.mxu2 %vm2035_vm1, %v1681_v38 }
 0x3e8   :  { %2665 = vmatpush.xpose.msk.msra.mxu2 %vm2035_vm1, %v1680_v50 }
 0x3ec   :  { %2666 = vmatpush.xpose.msk.msra.mxu2 %vm2035_vm1, %v1679_v6 }
 0x3f0   :  { %2667 = vmatpush.xpose.msk.msra.mxu2 %vm2035_vm1, %v1678_v12 }
 0x3f3   :  { %2668 = vmatmul.msk.f32.vlgmr.msra.gmra.mxu2 %vm2035_vm1, %v1758_v13 }
 0x3f6   :  { %v2288_v42 = vpop.f32.mrf.mxu3 }
 0x3f7   :  { %v2289_v43 = vadd.f32 %v2288_v42, %v2012_v58 }
 0x3f9   :  { %v2320_v11 = vadd.f32 %v2317_v16, %v2289_v43 }
 0x3fb   :  { %v2327_v49 = vrot.slane %v2320_v11, 6 }
 0x476   :  { %v2308_v10 = vpop.f32.mrf.mxu2 }
 0x477   :  { %v2309_v22 = vadd.f32 %v2308_v10, %v2032_v61 }
 0x479   :  { %v2321_v48 = vadd.f32 %v2317_v16, %v2309_v22 }
 0x47b   :  { %v2328_v20 = vrot.slane %v2321_v48, 5 }
 0x47d   :  { %v2332_v39 = vsel %vm2331_vm3, %v2327_v49, %v2328_v20 }
 0x47e   :  { %v2334_v18 = vsel %vm2333_vm4, %v2330_v34, %v2332_v39 }
 0x47f   :  { %2340 = vst.msk [vmem:[#allocation3] sm:$0xf] %vm2338_vm5, %v2334_v18 }
 0x480   :  { %2351 = dma.vmem_to_hbm [thread:$0]  %s2347_s20, 64, %s2349_s23, [#allocation4]  }
 0x481   :  { %2820 = dma.done.wait [#allocation4], 64  }
 0x482   :  { %2821 = vsyncadd [#allocation4], 4294967232 }
 0x483   :  { %2356 = vsyncpa [#allocation4], 1 }

</bundles_post_ra>
